<compile_context>
chip_gen: v5e
topology: v5e:2x2
jax: 0.10.0
libtpu: 0.0.40
codegen_flags: <defaults>
</compile_context>

<pallas_src>
import functools

import jax
import jax.numpy as jnp
from jax import lax
from jax.experimental import pallas as pl
from jax.experimental.pallas import tpu as pltpu

VOCAB = 30522       # fixed by word_dense in the PyTorch module
N_RATING = 5        # fixed by rating_dense
RATING_PAD = 128    # rating head padded to one lane tile inside the fused kernel
WORD_TN = 3840      # 3840 = 30*128 -> Np = 30720 -> 8 even tiles (4 per v7x core)
LN_EPS = 1e-12


def _round_up(x, m):
    return (x + m - 1) // m * m


# ----------------------------------------------------------------------------
# Fused encoder kernel: emb-LN -> QKV -> attention -> out-proj -> LN1 ->
# FFN(GELU) -> LN2 -> pooler(tanh) -> rating head.  One launch, all in VMEM,
# no scratch buffers (attention context / CLS rows live in vregs).
# ----------------------------------------------------------------------------
def _encoder_kernel(x_ref, emb_g_ref, emb_b_ref,
                    wqkv_ref, bqkv_ref, wo_ref, bo_ref,
                    ln1_g_ref, ln1_b_ref,
                    w1_ref, b1_ref, w2_ref, b2_ref,
                    ln2_g_ref, ln2_b_ref,
                    wp_ref, bp_ref, wr_ref, br_ref,
                    hid_ref, rating_ref,
                    *, B, S, H, nh):
    dh = H // nh
    scale = 1.0 / float(dh) ** 0.5

    def layer_norm(x, g_ref, b_ref):
        mu = jnp.mean(x, axis=-1, keepdims=True)
        d = x - mu
        var = jnp.mean(d * d, axis=-1, keepdims=True)
        return d * lax.rsqrt(var + LN_EPS) * g_ref[...] + b_ref[...]

    def gelu(x):
        # tanh-approx GELU. TODO(synk): PyTorch nn.GELU() defaults to erf form.
        return 0.5 * x * (1.0 + jnp.tanh(0.7978845608028654 *
                                         (x + 0.044715 * x * x * x)))

    # embedding layer-norm
    x = layer_norm(x_ref[...], emb_g_ref, emb_b_ref)            # (B*S, H)

    # fused QKV projection: one (H, 3H) matmul instead of three
    qkv = jnp.dot(x, wqkv_ref[...],
                  preferred_element_type=jnp.float32) + bqkv_ref[...]
    q = qkv[:, 0 * H:1 * H]
    k = qkv[:, 1 * H:2 * H]
    v = qkv[:, 2 * H:3 * H]

    # per-(batch, head) attention on static slices; context stays in vregs
    # (no VMEM scratch, no masked partial stores).
    ctx_rows = []
    for b in range(B):
        r0 = b * S
        head_ctx = []
        for h in range(nh):
            c0 = h * dh
            qb = q[r0:r0 + S, c0:c0 + dh]
            kb = k[r0:r0 + S, c0:c0 + dh]
            vb = v[r0:r0 + S, c0:c0 + dh]
            s = lax.dot_general(qb, kb, (((1,), (1,)), ((), ())),
                                preferred_element_type=jnp.float32) * scale
            s = s - jnp.max(s, axis=-1, keepdims=True)
            p = jnp.exp(s)
            p = p * pl.reciprocal(jnp.sum(p, axis=-1, keepdims=True),
                                  approx=True)
            head_ctx.append(jnp.dot(p, vb,
                                    preferred_element_type=jnp.float32))
        ctx_rows.append(jnp.concatenate(head_ctx, axis=-1))       # (S, H)
    ctx = jnp.concatenate(ctx_rows, axis=0)                       # (B*S, H)

    attn = jnp.dot(ctx, wo_ref[...],
                   preferred_element_type=jnp.float32) + bo_ref[...]
    x1 = layer_norm(x + attn, ln1_g_ref, ln1_b_ref)

    hmid = gelu(jnp.dot(x1, w1_ref[...],
                        preferred_element_type=jnp.float32) + b1_ref[...])
    ffn = jnp.dot(hmid, w2_ref[...],
                  preferred_element_type=jnp.float32) + b2_ref[...]
    x2 = layer_norm(x1 + ffn, ln2_g_ref, ln2_b_ref)
    hid_ref[...] = x2

    # pooler on CLS rows (static slices, register-resident) + rating head
    cls = jnp.concatenate([x2[b * S:b * S + 1, :] for b in range(B)], axis=0)
    pooled = jnp.tanh(jnp.dot(cls, wp_ref[...],
                              preferred_element_type=jnp.float32) + bp_ref[...])
    rating_ref[...] = jnp.dot(pooled, wr_ref[...],
                              preferred_element_type=jnp.float32) + br_ref[...]


def encoder_pallas(x_emb, p, *, batch, seq, num_heads):
    """x_emb: (B*S, H) f32 -> (last_hidden_flat, rating)."""
    H = x_emb.shape[1]
    kernel = functools.partial(_encoder_kernel, B=batch, S=seq, H=H, nh=num_heads)
    hid, rating_pad = pl.pallas_call(
        kernel,
        out_shape=(
            jax.ShapeDtypeStruct((batch * seq, H), jnp.float32),
            jax.ShapeDtypeStruct((batch, RATING_PAD), jnp.float32),
        ),
    )(x_emb,
      p["emb_ln_g"], p["emb_ln_b"],
      p["wqkv"], p["bqkv"], p["wo"], p["bo"],
      p["ln1_g"], p["ln1_b"],
      p["w1"], p["b1"], p["w2"], p["b2"],
      p["ln2_g"], p["ln2_b"],
      p["wp"], p["bp"], p["wr"], p["br"])
    return hid, rating_pad[:, :N_RATING]


# ----------------------------------------------------------------------------
# Word head: (B*S, H) @ (H, 30522) + b, tiled over N with 3840-wide tiles.
# Weight is stored bf16 and pre-tiled (num_tiles, H, tn) at init so every grid
# step is one contiguous ~240 KB DMA; it is widened to f32 in-kernel before
# the MXU (f32 accumulation, bf16-rounding of weights only).  Output is
# written unpadded f32 (Pallas masks the ragged last tile).
# ----------------------------------------------------------------------------
def _word_head_kernel(x_ref, w_ref, b_ref, o_ref):
    w = w_ref[...].astype(jnp.float32)
    o_ref[...] = (jnp.dot(x_ref[...], w,
                          preferred_element_type=jnp.float32)
                  + b_ref[...]).astype(o_ref.dtype)


def word_head_pallas(x, w_tiles, b_pad, n_out):
    M, K = x.shape
    nt, kw, tn = w_tiles.shape
    assert kw == K
    return pl.pallas_call(
        _word_head_kernel,
        out_shape=jax.ShapeDtypeStruct((M, n_out), jnp.float32),
        grid=(nt,),
        in_specs=[
            pl.BlockSpec((M, K), lambda j: (0, 0)),                 # activations resident
            pl.BlockSpec((pl.Squeezed(), K, tn), lambda j: (j, 0, 0)),  # contiguous bf16 tile
            pl.BlockSpec((1, tn), lambda j: (0, j)),                # bias tile
        ],
        out_specs=pl.BlockSpec((M, tn), lambda j: (0, j)),
        compiler_params=pltpu.CompilerParams(
            dimension_semantics=("parallel",)),                     # megacore-sharded on v7x
    )(x, w_tiles, b_pad)


# ----------------------------------------------------------------------------
# Parameters (synthetic tiny BERT) — padding / retiling done ONCE here,
# outside jit.
# ----------------------------------------------------------------------------
def init_params(key, *, vocab=VOCAB, hidden=32, seq=8, ffn=128):
    ks = jax.random.split(key, 16)
    n = lambda i, shape: (0.02 * jax.random.normal(ks[i], shape)).astype(jnp.float32)
    z = lambda shape: jnp.zeros(shape, jnp.float32)
    o = lambda shape: jnp.ones(shape, jnp.float32)

    word_np = _round_up(vocab, WORD_TN)     # 30720 -> 8 even tiles of 3840
    n_tiles = word_np // WORD_TN

    bert = dict(
        tok_emb=n(0, (vocab, hidden)),
        pos_emb=n(1, (seq, hidden)),
        type_emb=n(2, (2, hidden)),
        emb_ln_g=o((1, hidden)), emb_ln_b=z((1, hidden)),
        wqkv=n(3, (hidden, 3 * hidden)), bqkv=z((1, 3 * hidden)),
        wo=n(4, (hidden, hidden)), bo=z((1, hidden)),
        ln1_g=o((1, hidden)), ln1_b=z((1, hidden)),
        w1=n(5, (hidden, ffn)), b1=z((1, ffn)),
        w2=n(6, (ffn, hidden)), b2=z((1, hidden)),
        ln2_g=o((1, hidden)), ln2_b=z((1, hidden)),
        wp=n(7, (hidden, hidden)), bp=z((1, hidden)),           # pooler
        wr=jnp.pad(n(8, (hidden, N_RATING)),
                   ((0, 0), (0, RATING_PAD - N_RATING))),        # rating head
        br=z((1, RATING_PAD)),
    )

    # word head: pad to word_np, retile to (n_tiles, hidden, WORD_TN), cast bf16
    word_w = jnp.pad(n(9, (hidden, vocab)), ((0, 0), (0, word_np - vocab)))
    word_w = jnp.transpose(word_w.reshape(hidden, n_tiles, WORD_TN),
                           (1, 0, 2)).astype(jnp.bfloat16)
    params = dict(
        bert=bert,
        word_w=word_w,                      # (n_tiles, hidden, WORD_TN) bf16
        word_b=z((1, word_np)),             # bias stays f32 (tiny)
    )
    return params


# ----------------------------------------------------------------------------
# Forward
# ----------------------------------------------------------------------------
def pretrain_bert_forward(params, text_bert_indices, *, num_heads):
    p = params["bert"]
    B, S = text_bert_indices.shape
    H = p["tok_emb"].shape[1]

    # embedding gather + position + token-type(0): plain JAX glue
    x = (jnp.take(p["tok_emb"], text_bert_indices, axis=0)
         + p["pos_emb"][None, :S, :]
         + p["type_emb"][0][None, None, :])
    x = x.reshape(B * S, H)

    last_hidden_flat, rating = encoder_pallas(
        x, p, batch=B, seq=S, num_heads=num_heads)

    # nn.Dropout in eval mode is the identity (inference semantics).
    word = word_head_pallas(last_hidden_flat, params["word_w"],
                            params["word_b"], VOCAB).reshape(B, S, VOCAB)
    return word, rating


if __name__ == "__main__":
    key = jax.random.PRNGKey(0)
    k_param, k_ids = jax.random.split(key)

    B, S, H, HEADS, FFN = 2, 8, 32, 2, 128
    params = init_params(k_param, hidden=H, seq=S, ffn=FFN)
    text_bert_indices = jax.random.randint(k_ids, (B, S), 0, VOCAB, dtype=jnp.int32)

    fwd = jax.jit(functools.partial(pretrain_bert_forward, num_heads=HEADS))
    word, rating = fwd(params, text_bert_indices)
    jax.block_until_ready((word, rating))

    assert word.shape == (B, S, VOCAB) and word.dtype == jnp.float32
    assert rating.shape == (B, N_RATING) and rating.dtype == jnp.float32
    assert bool(jnp.all(jnp.isfinite(word))) and bool(jnp.all(jnp.isfinite(rating)))
    print("KERNEL_OK")
</pallas_src>

<mosaic_0001>
module attributes {stable_mosaic.version = 11 : i64} {
  func.func @_word_head_kernel(%arg0: i32, %arg1: memref<16x32xf32, #tpu.memory_space<vmem>>, %arg2: memref<1x32x3840xbf16, #tpu.memory_space<vmem>>, %arg3: memref<1x3840xf32, #tpu.memory_space<vmem>>, %arg4: memref<16x3840xf32, #tpu.memory_space<vmem>>) attributes {dimension_semantics = [#tpu.dimension_semantics<parallel>], iteration_bounds = array<i64: 8>, scalar_prefetch = 0 : i64, scratch_operands = 0 : i64, tpu.core_type = #tpu.core_type<tc>, window_params = [{pipeline_mode = #tpu.pipeline_mode<synchronous>, transform_indices = @transform_0, window_bounds = array<i64: 16, 32>}, {transform_indices = @transform_1, window_bounds = array<i64: 1, 32, 3840>}, {transform_indices = @transform_2, window_bounds = array<i64: 1, 3840>}, {transform_indices = @transform_3, window_bounds = array<i64: 16, 3840>}]} {
    %c0 = arith.constant 0 : index
    %c0_0 = arith.constant 0 : index
    %c0_1 = arith.constant 0 : index
    %0 = vector.load %arg2[%c0, %c0_0, %c0_1] : memref<1x32x3840xbf16, #tpu.memory_space<vmem>>, vector<1x32x3840xbf16>
    %1 = vector.shape_cast %0 : vector<1x32x3840xbf16> to vector<32x3840xbf16>
    %2 = arith.extf %1 : vector<32x3840xbf16> to vector<32x3840xf32>
    %c0_2 = arith.constant 0 : index
    %c0_3 = arith.constant 0 : index
    %3 = vector.load %arg1[%c0_2, %c0_3] : memref<16x32xf32, #tpu.memory_space<vmem>>, vector<16x32xf32>
    %cst = arith.constant dense<0.000000e+00> : vector<16x3840xf32>
    %4 = tpu.matmul %3, %2, %cst {dimension_numbers = #tpu.dot_dimension_numbers<[1], [0], [0], [1], [0, 0, 1, 1], [], []>} : vector<16x32xf32>, vector<32x3840xf32>, vector<16x3840xf32> -> vector<16x3840xf32>
    %c0_4 = arith.constant 0 : index
    %c0_5 = arith.constant 0 : index
    %5 = vector.load %arg3[%c0_4, %c0_5] : memref<1x3840xf32, #tpu.memory_space<vmem>>, vector<1x3840xf32>
    %6 = vector.broadcast %5 : vector<1x3840xf32> to vector<16x3840xf32>
    %7 = arith.addf %4, %6 : vector<16x3840xf32>
    %c0_6 = arith.constant 0 : index
    %c0_7 = arith.constant 0 : index
    %8 = vector.load %arg4[%c0_6, %c0_7] : memref<16x3840xf32, #tpu.memory_space<vmem>>, vector<16x3840xf32>
    tpu.vector_store %arg4[%c0_6, %c0_7], %7 {strides = array<i32>} : memref<16x3840xf32, #tpu.memory_space<vmem>>, vector<16x3840xf32>,
    return
  }
  func.func @transform_0(%arg0: i32) -> (i32, i32) {
    %c0_i32 = arith.constant 0 : i32
    %c0_i32_0 = arith.constant 0 : i32
    %c0_i32_1 = arith.constant 0 : i32
    return %c0_i32, %c0_i32_0 : i32, i32
  }
  func.func @transform_1(%arg0: i32) -> (i32, i32, i32) {
    %c0_i32 = arith.constant 0 : i32
    %c0_i32_0 = arith.constant 0 : i32
    %c0_i32_1 = arith.constant 0 : i32
    return %arg0, %c0_i32, %c0_i32_0 : i32, i32, i32
  }
  func.func @transform_2(%arg0: i32) -> (i32, i32) {
    %c0_i32 = arith.constant 0 : i32
    %c0_i32_0 = arith.constant 0 : i32
    return %c0_i32, %arg0 : i32, i32
  }
  func.func @transform_3(%arg0: i32) -> (i32, i32) {
    %c0_i32 = arith.constant 0 : i32
    %c0_i32_0 = arith.constant 0 : i32
    return %c0_i32, %arg0 : i32, i32
  }
}

module attributes {stable_mosaic.version = 11 : i64} {
  func.func @_encoder_kernel(%arg0: memref<16x32xf32, #tpu.memory_space<vmem>>, %arg1: memref<1x32xf32, #tpu.memory_space<vmem>>, %arg2: memref<1x32xf32, #tpu.memory_space<vmem>>, %arg3: memref<32x96xf32, #tpu.memory_space<vmem>>, %arg4: memref<1x96xf32, #tpu.memory_space<vmem>>, %arg5: memref<32x32xf32, #tpu.memory_space<vmem>>, %arg6: memref<1x32xf32, #tpu.memory_space<vmem>>, %arg7: memref<1x32xf32, #tpu.memory_space<vmem>>, %arg8: memref<1x32xf32, #tpu.memory_space<vmem>>, %arg9: memref<32x128xf32, #tpu.memory_space<vmem>>, %arg10: memref<1x128xf32, #tpu.memory_space<vmem>>, %arg11: memref<128x32xf32, #tpu.memory_space<vmem>>, %arg12: memref<1x32xf32, #tpu.memory_space<vmem>>, %arg13: memref<1x32xf32, #tpu.memory_space<vmem>>, %arg14: memref<1x32xf32, #tpu.memory_space<vmem>>, %arg15: memref<32x32xf32, #tpu.memory_space<vmem>>, %arg16: memref<1x32xf32, #tpu.memory_space<vmem>>, %arg17: memref<32x128xf32, #tpu.memory_space<vmem>>, %arg18: memref<1x128xf32, #tpu.memory_space<vmem>>, %arg19: memref<16x32xf32, #tpu.memory_space<vmem>>, %arg20: memref<2x128xf32, #tpu.memory_space<vmem>>) attributes {dimension_semantics = [], scalar_prefetch = 0 : i64, scratch_operands = 0 : i64, tpu.core_type = #tpu.core_type<tc>} {
    %c0 = arith.constant 0 : index
    %c0_0 = arith.constant 0 : index
    %0 = vector.load %arg0[%c0, %c0_0] : memref<16x32xf32, #tpu.memory_space<vmem>>, vector<16x32xf32>
    %cst = arith.constant dense<0.000000e+00> : vector<16xf32>
    %1 = vector.multi_reduction <add>, %0, %cst [1] : vector<16x32xf32> to vector<16xf32>
    %2 = vector.shape_cast %1 : vector<16xf32> to vector<16x1xf32>
    %cst_1 = arith.constant 3.200000e+01 : f32
    %3 = vector.broadcast %cst_1 : f32 to vector<16x1xf32>
    %4 = arith.divf %2, %3 : vector<16x1xf32>
    %5 = vector.broadcast %4 : vector<16x1xf32> to vector<16x32xf32>
    %6 = arith.subf %0, %5 : vector<16x32xf32>
    %7 = arith.mulf %6, %6 : vector<16x32xf32>
    %cst_2 = arith.constant dense<0.000000e+00> : vector<16xf32>
    %8 = vector.multi_reduction <add>, %7, %cst_2 [1] : vector<16x32xf32> to vector<16xf32>
    %9 = vector.shape_cast %8 : vector<16xf32> to vector<16x1xf32>
    %cst_3 = arith.constant 3.200000e+01 : f32
    %10 = vector.broadcast %cst_3 : f32 to vector<16x1xf32>
    %11 = arith.divf %9, %10 : vector<16x1xf32>
    %cst_4 = arith.constant 9.99999996E-13 : f32
    %12 = vector.broadcast %cst_4 : f32 to vector<16x1xf32>
    %13 = arith.addf %11, %12 : vector<16x1xf32>
    %14 = math.rsqrt %13 : vector<16x1xf32>
    %15 = vector.broadcast %14 : vector<16x1xf32> to vector<16x32xf32>
    %16 = arith.mulf %6, %15 : vector<16x32xf32>
    %c0_5 = arith.constant 0 : index
    %c0_6 = arith.constant 0 : index
    %17 = vector.load %arg1[%c0_5, %c0_6] : memref<1x32xf32, #tpu.memory_space<vmem>>, vector<1x32xf32>
    %18 = vector.broadcast %17 : vector<1x32xf32> to vector<16x32xf32>
    %19 = arith.mulf %16, %18 : vector<16x32xf32>
    %c0_7 = arith.constant 0 : index
    %c0_8 = arith.constant 0 : index
    %20 = vector.load %arg2[%c0_7, %c0_8] : memref<1x32xf32, #tpu.memory_space<vmem>>, vector<1x32xf32>
    %21 = vector.broadcast %20 : vector<1x32xf32> to vector<16x32xf32>
    %22 = arith.addf %19, %21 : vector<16x32xf32>
    %c0_9 = arith.constant 0 : index
    %c0_10 = arith.constant 0 : index
    %23 = vector.load %arg3[%c0_9, %c0_10] : memref<32x96xf32, #tpu.memory_space<vmem>>, vector<32x96xf32>
    %cst_11 = arith.constant dense<0.000000e+00> : vector<16x96xf32>
    %24 = tpu.matmul %22, %23, %cst_11 {dimension_numbers = #tpu.dot_dimension_numbers<[1], [0], [0], [1], [0, 0, 1, 1], [], []>} : vector<16x32xf32>, vector<32x96xf32>, vector<16x96xf32> -> vector<16x96xf32>
    %c0_12 = arith.constant 0 : index
    %c0_13 = arith.constant 0 : index
    %25 = vector.load %arg4[%c0_12, %c0_13] : memref<1x96xf32, #tpu.memory_space<vmem>>, vector<1x96xf32>
    %26 = vector.broadcast %25 : vector<1x96xf32> to vector<16x96xf32>
    %27 = arith.addf %24, %26 : vector<16x96xf32>
    %28 = vector.extract_strided_slice %27 {offsets = [0, 0], sizes = [16, 32], strides = [1, 1]} : vector<16x96xf32> to vector<16x32xf32>
    %29 = vector.extract_strided_slice %27 {offsets = [0, 32], sizes = [16, 32], strides = [1, 1]} : vector<16x96xf32> to vector<16x32xf32>
    %30 = vector.extract_strided_slice %27 {offsets = [0, 64], sizes = [16, 32], strides = [1, 1]} : vector<16x96xf32> to vector<16x32xf32>
    %31 = vector.extract_strided_slice %28 {offsets = [0, 0], sizes = [8, 16], strides = [1, 1]} : vector<16x32xf32> to vector<8x16xf32>
    %32 = vector.extract_strided_slice %29 {offsets = [0, 0], sizes = [8, 16], strides = [1, 1]} : vector<16x32xf32> to vector<8x16xf32>
    %33 = vector.extract_strided_slice %30 {offsets = [0, 0], sizes = [8, 16], strides = [1, 1]} : vector<16x32xf32> to vector<8x16xf32>
    %cst_14 = arith.constant dense<0.000000e+00> : vector<8x8xf32>
    %34 = tpu.matmul %31, %32, %cst_14 {dimension_numbers = #tpu.dot_dimension_numbers<[1], [1], [0], [0], [0, 0, 1, 0], [], []>} : vector<8x16xf32>, vector<8x16xf32>, vector<8x8xf32> -> vector<8x8xf32>
    %cst_15 = arith.constant 2.500000e-01 : f32
    %35 = vector.broadcast %cst_15 : f32 to vector<8x8xf32>
    %36 = arith.mulf %34, %35 : vector<8x8xf32>
    %cst_16 = arith.constant dense<0xFF800000> : vector<8xf32>
    %37 = vector.multi_reduction <maximumf>, %36, %cst_16 [1] : vector<8x8xf32> to vector<8xf32>
    %38 = vector.shape_cast %37 : vector<8xf32> to vector<8x1xf32>
    %39 = vector.broadcast %38 : vector<8x1xf32> to vector<8x8xf32>
    %40 = arith.subf %36, %39 : vector<8x8xf32>
    %41 = math.exp %40 : vector<8x8xf32>
    %cst_17 = arith.constant dense<0.000000e+00> : vector<8xf32>
    %42 = vector.multi_reduction <add>, %41, %cst_17 [1] : vector<8x8xf32> to vector<8xf32>
    %43 = vector.shape_cast %42 : vector<8xf32> to vector<8x1xf32>
    %44 = tpu.reciprocal %43 {approx = true} : vector<8x1xf32> -> vector<8x1xf32>
    %45 = vector.broadcast %44 : vector<8x1xf32> to vector<8x8xf32>
    %46 = arith.mulf %41, %45 : vector<8x8xf32>
    %cst_18 = arith.constant dense<0.000000e+00> : vector<8x16xf32>
    %47 = tpu.matmul %46, %33, %cst_18 {dimension_numbers = #tpu.dot_dimension_numbers<[1], [0], [0], [1], [0, 0, 1, 1], [], []>} : vector<8x8xf32>, vector<8x16xf32>, vector<8x16xf32> -> vector<8x16xf32>
    %48 = vector.extract_strided_slice %28 {offsets = [0, 16], sizes = [8, 16], strides = [1, 1]} : vector<16x32xf32> to vector<8x16xf32>
    %49 = vector.extract_strided_slice %29 {offsets = [0, 16], sizes = [8, 16], strides = [1, 1]} : vector<16x32xf32> to vector<8x16xf32>
    %50 = vector.extract_strided_slice %30 {offsets = [0, 16], sizes = [8, 16], strides = [1, 1]} : vector<16x32xf32> to vector<8x16xf32>
    %cst_19 = arith.constant dense<0.000000e+00> : vector<8x8xf32>
    %51 = tpu.matmul %48, %49, %cst_19 {dimension_numbers = #tpu.dot_dimension_numbers<[1], [1], [0], [0], [0, 0, 1, 0], [], []>} : vector<8x16xf32>, vector<8x16xf32>, vector<8x8xf32> -> vector<8x8xf32>
    %cst_20 = arith.constant 2.500000e-01 : f32
    %52 = vector.broadcast %cst_20 : f32 to vector<8x8xf32>
    %53 = arith.mulf %51, %52 : vector<8x8xf32>
    %cst_21 = arith.constant dense<0xFF800000> : vector<8xf32>
    %54 = vector.multi_reduction <maximumf>, %53, %cst_21 [1] : vector<8x8xf32> to vector<8xf32>
    %55 = vector.shape_cast %54 : vector<8xf32> to vector<8x1xf32>
    %56 = vector.broadcast %55 : vector<8x1xf32> to vector<8x8xf32>
    %57 = arith.subf %53, %56 : vector<8x8xf32>
    %58 = math.exp %57 : vector<8x8xf32>
    %cst_22 = arith.constant dense<0.000000e+00> : vector<8xf32>
    %59 = vector.multi_reduction <add>, %58, %cst_22 [1] : vector<8x8xf32> to vector<8xf32>
    %60 = vector.shape_cast %59 : vector<8xf32> to vector<8x1xf32>
    %61 = tpu.reciprocal %60 {approx = true} : vector<8x1xf32> -> vector<8x1xf32>
    %62 = vector.broadcast %61 : vector<8x1xf32> to vector<8x8xf32>
    %63 = arith.mulf %58, %62 : vector<8x8xf32>
    %cst_23 = arith.constant dense<0.000000e+00> : vector<8x16xf32>
    %64 = tpu.matmul %63, %50, %cst_23 {dimension_numbers = #tpu.dot_dimension_numbers<[1], [0], [0], [1], [0, 0, 1, 1], [], []>} : vector<8x8xf32>, vector<8x16xf32>, vector<8x16xf32> -> vector<8x16xf32>
    %65 = tpu.concatenate %47, %64 in 1 : vector<8x16xf32>, vector<8x16xf32> -> vector<8x32xf32>
    %66 = vector.extract_strided_slice %28 {offsets = [8, 0], sizes = [8, 16], strides = [1, 1]} : vector<16x32xf32> to vector<8x16xf32>
    %67 = vector.extract_strided_slice %29 {offsets = [8, 0], sizes = [8, 16], strides = [1, 1]} : vector<16x32xf32> to vector<8x16xf32>
    %68 = vector.extract_strided_slice %30 {offsets = [8, 0], sizes = [8, 16], strides = [1, 1]} : vector<16x32xf32> to vector<8x16xf32>
    %cst_24 = arith.constant dense<0.000000e+00> : vector<8x8xf32>
    %69 = tpu.matmul %66, %67, %cst_24 {dimension_numbers = #tpu.dot_dimension_numbers<[1], [1], [0], [0], [0, 0, 1, 0], [], []>} : vector<8x16xf32>, vector<8x16xf32>, vector<8x8xf32> -> vector<8x8xf32>
    %cst_25 = arith.constant 2.500000e-01 : f32
    %70 = vector.broadcast %cst_25 : f32 to vector<8x8xf32>
    %71 = arith.mulf %69, %70 : vector<8x8xf32>
    %cst_26 = arith.constant dense<0xFF800000> : vector<8xf32>
    %72 = vector.multi_reduction <maximumf>, %71, %cst_26 [1] : vector<8x8xf32> to vector<8xf32>
    %73 = vector.shape_cast %72 : vector<8xf32> to vector<8x1xf32>
    %74 = vector.broadcast %73 : vector<8x1xf32> to vector<8x8xf32>
    %75 = arith.subf %71, %74 : vector<8x8xf32>
    %76 = math.exp %75 : vector<8x8xf32>
    %cst_27 = arith.constant dense<0.000000e+00> : vector<8xf32>
    %77 = vector.multi_reduction <add>, %76, %cst_27 [1] : vector<8x8xf32> to vector<8xf32>
    %78 = vector.shape_cast %77 : vector<8xf32> to vector<8x1xf32>
    %79 = tpu.reciprocal %78 {approx = true} : vector<8x1xf32> -> vector<8x1xf32>
    %80 = vector.broadcast %79 : vector<8x1xf32> to vector<8x8xf32>
    %81 = arith.mulf %76, %80 : vector<8x8xf32>
    %cst_28 = arith.constant dense<0.000000e+00> : vector<8x16xf32>
    %82 = tpu.matmul %81, %68, %cst_28 {dimension_numbers = #tpu.dot_dimension_numbers<[1], [0], [0], [1], [0, 0, 1, 1], [], []>} : vector<8x8xf32>, vector<8x16xf32>, vector<8x16xf32> -> vector<8x16xf32>
    %83 = vector.extract_strided_slice %28 {offsets = [8, 16], sizes = [8, 16], strides = [1, 1]} : vector<16x32xf32> to vector<8x16xf32>
    %84 = vector.extract_strided_slice %29 {offsets = [8, 16], sizes = [8, 16], strides = [1, 1]} : vector<16x32xf32> to vector<8x16xf32>
    %85 = vector.extract_strided_slice %30 {offsets = [8, 16], sizes = [8, 16], strides = [1, 1]} : vector<16x32xf32> to vector<8x16xf32>
    %cst_29 = arith.constant dense<0.000000e+00> : vector<8x8xf32>
    %86 = tpu.matmul %83, %84, %cst_29 {dimension_numbers = #tpu.dot_dimension_numbers<[1], [1], [0], [0], [0, 0, 1, 0], [], []>} : vector<8x16xf32>, vector<8x16xf32>, vector<8x8xf32> -> vector<8x8xf32>
    %cst_30 = arith.constant 2.500000e-01 : f32
    %87 = vector.broadcast %cst_30 : f32 to vector<8x8xf32>
    %88 = arith.mulf %86, %87 : vector<8x8xf32>
    %cst_31 = arith.constant dense<0xFF800000> : vector<8xf32>
    %89 = vector.multi_reduction <maximumf>, %88, %cst_31 [1] : vector<8x8xf32> to vector<8xf32>
    %90 = vector.shape_cast %89 : vector<8xf32> to vector<8x1xf32>
    %91 = vector.broadcast %90 : vector<8x1xf32> to vector<8x8xf32>
    %92 = arith.subf %88, %91 : vector<8x8xf32>
    %93 = math.exp %92 : vector<8x8xf32>
    %cst_32 = arith.constant dense<0.000000e+00> : vector<8xf32>
    %94 = vector.multi_reduction <add>, %93, %cst_32 [1] : vector<8x8xf32> to vector<8xf32>
    %95 = vector.shape_cast %94 : vector<8xf32> to vector<8x1xf32>
    %96 = tpu.reciprocal %95 {approx = true} : vector<8x1xf32> -> vector<8x1xf32>
    %97 = vector.broadcast %96 : vector<8x1xf32> to vector<8x8xf32>
    %98 = arith.mulf %93, %97 : vector<8x8xf32>
    %cst_33 = arith.constant dense<0.000000e+00> : vector<8x16xf32>
    %99 = tpu.matmul %98, %85, %cst_33 {dimension_numbers = #tpu.dot_dimension_numbers<[1], [0], [0], [1], [0, 0, 1, 1], [], []>} : vector<8x8xf32>, vector<8x16xf32>, vector<8x16xf32> -> vector<8x16xf32>
    %100 = tpu.concatenate %82, %99 in 1 : vector<8x16xf32>, vector<8x16xf32> -> vector<8x32xf32>
    %101 = tpu.concatenate %65, %100 in 0 : vector<8x32xf32>, vector<8x32xf32> -> vector<16x32xf32>
    %c0_34 = arith.constant 0 : index
    %c0_35 = arith.constant 0 : index
    %102 = vector.load %arg5[%c0_34, %c0_35] : memref<32x32xf32, #tpu.memory_space<vmem>>, vector<32x32xf32>
    %cst_36 = arith.constant dense<0.000000e+00> : vector<16x32xf32>
    %103 = tpu.matmul %101, %102, %cst_36 {dimension_numbers = #tpu.dot_dimension_numbers<[1], [0], [0], [1], [0, 0, 1, 1], [], []>} : vector<16x32xf32>, vector<32x32xf32>, vector<16x32xf32> -> vector<16x32xf32>
    %c0_37 = arith.constant 0 : index
    %c0_38 = arith.constant 0 : index
    %104 = vector.load %arg6[%c0_37, %c0_38] : memref<1x32xf32, #tpu.memory_space<vmem>>, vector<1x32xf32>
    %105 = vector.broadcast %104 : vector<1x32xf32> to vector<16x32xf32>
    %106 = arith.addf %103, %105 : vector<16x32xf32>
    %107 = arith.addf %22, %106 : vector<16x32xf32>
    %cst_39 = arith.constant dense<0.000000e+00> : vector<16xf32>
    %108 = vector.multi_reduction <add>, %107, %cst_39 [1] : vector<16x32xf32> to vector<16xf32>
    %109 = vector.shape_cast %108 : vector<16xf32> to vector<16x1xf32>
    %cst_40 = arith.constant 3.200000e+01 : f32
    %110 = vector.broadcast %cst_40 : f32 to vector<16x1xf32>
    %111 = arith.divf %109, %110 : vector<16x1xf32>
    %112 = vector.broadcast %111 : vector<16x1xf32> to vector<16x32xf32>
    %113 = arith.subf %107, %112 : vector<16x32xf32>
    %114 = arith.mulf %113, %113 : vector<16x32xf32>
    %cst_41 = arith.constant dense<0.000000e+00> : vector<16xf32>
    %115 = vector.multi_reduction <add>, %114, %cst_41 [1] : vector<16x32xf32> to vector<16xf32>
    %116 = vector.shape_cast %115 : vector<16xf32> to vector<16x1xf32>
    %cst_42 = arith.constant 3.200000e+01 : f32
    %117 = vector.broadcast %cst_42 : f32 to vector<16x1xf32>
    %118 = arith.divf %116, %117 : vector<16x1xf32>
    %cst_43 = arith.constant 9.99999996E-13 : f32
    %119 = vector.broadcast %cst_43 : f32 to vector<16x1xf32>
    %120 = arith.addf %118, %119 : vector<16x1xf32>
    %121 = math.rsqrt %120 : vector<16x1xf32>
    %122 = vector.broadcast %121 : vector<16x1xf32> to vector<16x32xf32>
    %123 = arith.mulf %113, %122 : vector<16x32xf32>
    %c0_44 = arith.constant 0 : index
    %c0_45 = arith.constant 0 : index
    %124 = vector.load %arg7[%c0_44, %c0_45] : memref<1x32xf32, #tpu.memory_space<vmem>>, vector<1x32xf32>
    %125 = vector.broadcast %124 : vector<1x32xf32> to vector<16x32xf32>
    %126 = arith.mulf %123, %125 : vector<16x32xf32>
    %c0_46 = arith.constant 0 : index
    %c0_47 = arith.constant 0 : index
    %127 = vector.load %arg8[%c0_46, %c0_47] : memref<1x32xf32, #tpu.memory_space<vmem>>, vector<1x32xf32>
    %128 = vector.broadcast %127 : vector<1x32xf32> to vector<16x32xf32>
    %129 = arith.addf %126, %128 : vector<16x32xf32>
    %c0_48 = arith.constant 0 : index
    %c0_49 = arith.constant 0 : index
    %130 = vector.load %arg9[%c0_48, %c0_49] : memref<32x128xf32, #tpu.memory_space<vmem>>, vector<32x128xf32>
    %cst_50 = arith.constant dense<0.000000e+00> : vector<16x128xf32>
    %131 = tpu.matmul %129, %130, %cst_50 {dimension_numbers = #tpu.dot_dimension_numbers<[1], [0], [0], [1], [0, 0, 1, 1], [], []>} : vector<16x32xf32>, vector<32x128xf32>, vector<16x128xf32> -> vector<16x128xf32>
    %c0_51 = arith.constant 0 : index
    %c0_52 = arith.constant 0 : index
    %132 = vector.load %arg10[%c0_51, %c0_52] : memref<1x128xf32, #tpu.memory_space<vmem>>, vector<1x128xf32>
    %133 = vector.broadcast %132 : vector<1x128xf32> to vector<16x128xf32>
    %134 = arith.addf %131, %133 : vector<16x128xf32>
    %cst_53 = arith.constant 5.000000e-01 : f32
    %135 = vector.broadcast %cst_53 : f32 to vector<16x128xf32>
    %136 = arith.mulf %135, %134 : vector<16x128xf32>
    %cst_54 = arith.constant 4.471500e-02 : f32
    %137 = vector.broadcast %cst_54 : f32 to vector<16x128xf32>
    %138 = arith.mulf %137, %134 : vector<16x128xf32>
    %139 = arith.mulf %138, %134 : vector<16x128xf32>
    %140 = arith.mulf %139, %134 : vector<16x128xf32>
    %141 = arith.addf %134, %140 : vector<16x128xf32>
    %cst_55 = arith.constant 0.797884583 : f32
    %142 = vector.broadcast %cst_55 : f32 to vector<16x128xf32>
    %143 = arith.mulf %142, %141 : vector<16x128xf32>
    %144 = math.tanh %143 : vector<16x128xf32>
    %cst_56 = arith.constant 1.000000e+00 : f32
    %145 = vector.broadcast %cst_56 : f32 to vector<16x128xf32>
    %146 = arith.addf %145, %144 : vector<16x128xf32>
    %147 = arith.mulf %136, %146 : vector<16x128xf32>
    %c0_57 = arith.constant 0 : index
    %c0_58 = arith.constant 0 : index
    %148 = vector.load %arg11[%c0_57, %c0_58] : memref<128x32xf32, #tpu.memory_space<vmem>>, vector<128x32xf32>
    %cst_59 = arith.constant dense<0.000000e+00> : vector<16x32xf32>
    %149 = tpu.matmul %147, %148, %cst_59 {dimension_numbers = #tpu.dot_dimension_numbers<[1], [0], [0], [1], [0, 0, 1, 1], [], []>} : vector<16x128xf32>, vector<128x32xf32>, vector<16x32xf32> -> vector<16x32xf32>
    %c0_60 = arith.constant 0 : index
    %c0_61 = arith.constant 0 : index
    %150 = vector.load %arg12[%c0_60, %c0_61] : memref<1x32xf32, #tpu.memory_space<vmem>>, vector<1x32xf32>
    %151 = vector.broadcast %150 : vector<1x32xf32> to vector<16x32xf32>
    %152 = arith.addf %149, %151 : vector<16x32xf32>
    %153 = arith.addf %129, %152 : vector<16x32xf32>
    %cst_62 = arith.constant dense<0.000000e+00> : vector<16xf32>
    %154 = vector.multi_reduction <add>, %153, %cst_62 [1] : vector<16x32xf32> to vector<16xf32>
    %155 = vector.shape_cast %154 : vector<16xf32> to vector<16x1xf32>
    %cst_63 = arith.constant 3.200000e+01 : f32
    %156 = vector.broadcast %cst_63 : f32 to vector<16x1xf32>
    %157 = arith.divf %155, %156 : vector<16x1xf32>
    %158 = vector.broadcast %157 : vector<16x1xf32> to vector<16x32xf32>
    %159 = arith.subf %153, %158 : vector<16x32xf32>
    %160 = arith.mulf %159, %159 : vector<16x32xf32>
    %cst_64 = arith.constant dense<0.000000e+00> : vector<16xf32>
    %161 = vector.multi_reduction <add>, %160, %cst_64 [1] : vector<16x32xf32> to vector<16xf32>
    %162 = vector.shape_cast %161 : vector<16xf32> to vector<16x1xf32>
    %cst_65 = arith.constant 3.200000e+01 : f32
    %163 = vector.broadcast %cst_65 : f32 to vector<16x1xf32>
    %164 = arith.divf %162, %163 : vector<16x1xf32>
    %cst_66 = arith.constant 9.99999996E-13 : f32
    %165 = vector.broadcast %cst_66 : f32 to vector<16x1xf32>
    %166 = arith.addf %164, %165 : vector<16x1xf32>
    %167 = math.rsqrt %166 : vector<16x1xf32>
    %168 = vector.broadcast %167 : vector<16x1xf32> to vector<16x32xf32>
    %169 = arith.mulf %159, %168 : vector<16x32xf32>
    %c0_67 = arith.constant 0 : index
    %c0_68 = arith.constant 0 : index
    %170 = vector.load %arg13[%c0_67, %c0_68] : memref<1x32xf32, #tpu.memory_space<vmem>>, vector<1x32xf32>
    %171 = vector.broadcast %170 : vector<1x32xf32> to vector<16x32xf32>
    %172 = arith.mulf %169, %171 : vector<16x32xf32>
    %c0_69 = arith.constant 0 : index
    %c0_70 = arith.constant 0 : index
    %173 = vector.load %arg14[%c0_69, %c0_70] : memref<1x32xf32, #tpu.memory_space<vmem>>, vector<1x32xf32>
    %174 = vector.broadcast %173 : vector<1x32xf32> to vector<16x32xf32>
    %175 = arith.addf %172, %174 : vector<16x32xf32>
    %c0_71 = arith.constant 0 : index
    %c0_72 = arith.constant 0 : index
    %176 = vector.load %arg19[%c0_71, %c0_72] : memref<16x32xf32, #tpu.memory_space<vmem>>, vector<16x32xf32>
    tpu.vector_store %arg19[%c0_71, %c0_72], %175 {strides = array<i32>} : memref<16x32xf32, #tpu.memory_space<vmem>>, vector<16x32xf32>,
    %177 = vector.extract_strided_slice %175 {offsets = [0, 0], sizes = [1, 32], strides = [1, 1]} : vector<16x32xf32> to vector<1x32xf32>
    %178 = vector.extract_strided_slice %175 {offsets = [8, 0], sizes = [1, 32], strides = [1, 1]} : vector<16x32xf32> to vector<1x32xf32>
    %179 = tpu.concatenate %177, %178 in 0 : vector<1x32xf32>, vector<1x32xf32> -> vector<2x32xf32>
    %c0_73 = arith.constant 0 : index
    %c0_74 = arith.constant 0 : index
    %180 = vector.load %arg15[%c0_73, %c0_74] : memref<32x32xf32, #tpu.memory_space<vmem>>, vector<32x32xf32>
    %cst_75 = arith.constant dense<0.000000e+00> : vector<2x32xf32>
    %181 = tpu.matmul %179, %180, %cst_75 {dimension_numbers = #tpu.dot_dimension_numbers<[1], [0], [0], [1], [0, 0, 1, 1], [], []>} : vector<2x32xf32>, vector<32x32xf32>, vector<2x32xf32> -> vector<2x32xf32>
    %c0_76 = arith.constant 0 : index
    %c0_77 = arith.constant 0 : index
    %182 = vector.load %arg16[%c0_76, %c0_77] : memref<1x32xf32, #tpu.memory_space<vmem>>, vector<1x32xf32>
    %183 = vector.broadcast %182 : vector<1x32xf32> to vector<2x32xf32>
    %184 = arith.addf %181, %183 : vector<2x32xf32>
    %185 = math.tanh %184 : vector<2x32xf32>
    %c0_78 = arith.constant 0 : index
    %c0_79 = arith.constant 0 : index
    %186 = vector.load %arg17[%c0_78, %c0_79] : memref<32x128xf32, #tpu.memory_space<vmem>>, vector<32x128xf32>
    %cst_80 = arith.constant dense<0.000000e+00> : vector<2x128xf32>
    %187 = tpu.matmul %185, %186, %cst_80 {dimension_numbers = #tpu.dot_dimension_numbers<[1], [0], [0], [1], [0, 0, 1, 1], [], []>} : vector<2x32xf32>, vector<32x128xf32>, vector<2x128xf32> -> vector<2x128xf32>
    %c0_81 = arith.constant 0 : index
    %c0_82 = arith.constant 0 : index
    %188 = vector.load %arg18[%c0_81, %c0_82] : memref<1x128xf32, #tpu.memory_space<vmem>>, vector<1x128xf32>
    %189 = vector.broadcast %188 : vector<1x128xf32> to vector<2x128xf32>
    %190 = arith.addf %187, %189 : vector<2x128xf32>
    %c0_83 = arith.constant 0 : index
    %c0_84 = arith.constant 0 : index
    %191 = vector.load %arg20[%c0_83, %c0_84] : memref<2x128xf32, #tpu.memory_space<vmem>>, vector<2x128xf32>
    tpu.vector_store %arg20[%c0_83, %c0_84], %190 {strides = array<i32>} : memref<2x128xf32, #tpu.memory_space<vmem>>, vector<2x128xf32>,
    return
  }
}

</mosaic_0001>

<bundles_post_ra>
// kernel: pretrain_bert_forward.2
= control target key start
LH: loop header
LB: loop body
LE: loop exit
PB: predicated region body
PF: predicated region fallthrough
CT: control target
= control target key end

     0   :  { %s1247_s0 = inlined_call_operand.vmem [shape: f32[16,32], index: 0, kind: input, shape index: {}]   ;;  %s1248_s1 = inlined_call_operand.vmem [shape: f32[1,32], index: 1, kind: input, shape index: {}]   ;;  %s1249_s2 = inlined_call_operand.vmem [shape: f32[1,32], index: 2, kind: input, shape index: {}]   ;;  %s1250_s3 = inlined_call_operand.vmem [shape: f32[32,96], index: 3, kind: input, shape index: {}]   ;;  %s1251_s4 = inlined_call_operand.vmem [shape: f32[1,96], index: 4, kind: input, shape index: {}]   ;;  %s1252_s5 = inlined_call_operand.vmem [shape: f32[32,32], index: 5, kind: input, shape index: {}]   ;;  %s1253_s6 = inlined_call_operand.vmem [shape: f32[1,32], index: 6, kind: input, shape index: {}]   ;;  %s1254_s7 = inlined_call_operand.vmem [shape: f32[1,32], index: 7, kind: input, shape index: {}]   ;;  %s1255_s8 = inlined_call_operand.vmem [shape: f32[1,32], index: 8, kind: input, shape index: {}]   ;;  %s1256_s9 = inlined_call_operand.vmem [shape: f32[32,128], index: 9, kind: input, shape index: {}]   ;;  %s1257_s10 = inlined_call_operand.vmem [shape: f32[1,128], index: 10, kind: input, shape index: {}]   ;;  %s1258_s11 = inlined_call_operand.vmem [shape: f32[128,32], index: 11, kind: input, shape index: {}]   ;;  %s1259_s12 = inlined_call_operand.vmem [shape: f32[1,32], index: 12, kind: input, shape index: {}]   ;;  %s1260_s13 = inlined_call_operand.vmem [shape: f32[1,32], index: 13, kind: input, shape index: {}]   ;;  %s1261_s14 = inlined_call_operand.vmem [shape: f32[1,32], index: 14, kind: input, shape index: {}]   ;;  %s1262_s15 = inlined_call_operand.vmem [shape: f32[32,32], index: 15, kind: input, shape index: {}]   ;;  %s1263_s16 = inlined_call_operand.vmem [shape: f32[1,32], index: 16, kind: input, shape index: {}]   ;;  %s1264_s17 = inlined_call_operand.vmem [shape: f32[32,128], index: 17, kind: input, shape index: {}]   ;;  %s1265_s18 = inlined_call_operand.vmem [shape: f32[1,128], index: 18, kind: input, shape index: {}]   ;;  %s1266_s19 = inlined_call_operand.vmem [shape: f32[16,32], index: 19, kind: output, shape index: {0}]   ;;  %s1267_s20 = inlined_call_operand.hbm [shape: f32[2,128], index: 20, kind: output, shape index: {1}]  }
   0x1   :  { %1270 = sst [smem:[#allocation5_spill]] %s1247_s0 }
   0x2   :  { %1271 = sst [smem:[#allocation6_spill]] %s1248_s1 }
   0x3   :  { %1272 = sst [smem:[#allocation7_spill]] %s1249_s2 }
   0x4   :  { %1273 = sst [smem:[#allocation8_spill]] %s1250_s3 }
   0x5   :  { %1274 = sst [smem:[#allocation9_spill]] %s1251_s4 }
   0x6   :  { %s1275_s23 = sld [smem:[#allocation5_spill]]  ;;  %vm67_vm0 = vcmask 261120  }
   0xc   :  { %v65_v0 = vld [vmem:[%s1275_s23] sm:$0xff] }
   0xd   :  { %v68_v1 = vsel %vm67_vm0, %v65_v0, 0.0 }
   0xe   :  { %69 = vadd.xlane.f32.xlu0 %v68_v1 }
   0xf   :  { %26 = vsyncpa [#allocation3], 0  ;;  %v886_v2 = vmov 32.0   ;;  %s1276_s25 = sld [smem:[#allocation8_spill]]  ;;  %s887_s26 = smov 80   ;;  %v66_v36 = vld [vmem:[%s1275_s23 + $0x8] sm:$0xff] }
  0x10   :  { %824 = vrcp.f32 %v886_v2  ;;  %s1277_s21 = sld [smem:[#allocation6_spill]]  ;;  %s888_s27 = smov 96   ;;  %v71_v37 = vsel %vm67_vm0, %v66_v36, 0.0  ;;  %vm171_vm5 = vcmask 130048   ;;  %vm197_vm6 = vcmask 64512  }
  0x11   :  { %s1278_s24 = sld [smem:[#allocation7_spill]]  ;;  %s889_s23 = smov 64  }
  0x12   :  { %s1279_s3 = sld [smem:[#allocation9_spill]]  ;;  %s890_s29 = smov 112  }
  0x13   :  { %s891_s30 = smov 48   ;;  %s892_s0 = smov 16  }
  0x14   :  { %s773_s22 = sshll.u32 %s1267_s20, 4  ;;  %s774_s22 = int_to_ptr.hbm [resolvable:$true] %s773_s22 }
  0x15   :  { %v134_v14 = vld [vmem:[%s1276_s25 + $0x18] sm:$0xff]  ;;  %v133_v15 = vld [vmem:[%s1276_s25 + $0x10] sm:$0xff]  ;;  %v132_v16 = vld [vmem:[%s1276_s25 + $0x8] sm:$0xff] }
  0x16   :  { %v825_v3 = vpop.eup %824  ;;  %157 = vmatpush.msra.mxu0 %v134_v14  ;;  %v131_v17 = vld [vmem:[%s1276_s25] sm:$0xff] }
  0x17   :  { %v75_v4 = vmul.f32 32.0, %v825_v3  ;;  %vm79_vm1 = vweird.f32 %v825_v3  ;;  %v812_v27 = vld [vmem:[%s1277_s21] ss:$0 sm:$0xff] }
  0x18   :  { %158 = vmatpush.msra.mxu0 %v133_v15  ;;  %v813_v30 = vld [vmem:[%s1278_s24] ss:$0 sm:$0xff] }
  0x19   :  { %v76_v5 = vsub.f32 1.0, %v75_v4  ;;  %v814_v33 = vld [vmem:[%s1279_s3] ss:$0 sm:$0xff] }
  0x1a   :  { %159 = vmatpush.msra.mxu0 %v132_v16 }
  0x1b   :  { %v77_v6 = vmul.f32 %v825_v3, %v76_v5 }
  0x1c   :  { %160 = vmatpush.msra.mxu0 %v131_v17 }
  0x1d   :  { %v78_v7 = vadd.f32 %v825_v3, %v77_v6 }
  0x1f   :  { %v1003_v8 = vsel %vm79_vm1, %v825_v3, %v78_v7 }
  0x81   :  { %v70_v9 = vpop.xlane.xlu0 %69 }
  0x82   :  { %v81_v10 = vmul.f32 %v1003_v8, %v70_v9 }
  0x84   :  { %v83_v11 = vsub.f32 %v65_v0, %v81_v10 }
  0x86   :  { %v85_v12 = vmul.f32 %v83_v11, %v83_v11 }
  0x88   :  { %v87_v13 = vsel %vm67_vm0, %v85_v12, 0.0 }
  0x89   :  { %88 = vadd.xlane.f32.xlu0 %v87_v13 }
  0xfc   :  { %v89_v18 = vpop.xlane.xlu0 %88 }
  0xfd   :  { %v93_v19 = vmul.f32 %v89_v18, %v1003_v8 }
  0xff   :  { %v95_v20 = vadd.f32 1e-12, %v93_v19 }
 0x101   :  { %826 = vrsqrt.f32 %v95_v20  ;;  %vm103_vm3 = vweird.f32 %v95_v20 }
 0x107   :  { %v827_v21 = vpop.eup %826 }
 0x108   :  { %v98_v22 = vmul.f32 %v827_v21, %v95_v20  ;;  %vm104_vm2 = vweird.f32 %v827_v21 }
 0x109   :  { %vm105_vm4 = vmor %vm103_vm3, %vm104_vm2 }
 0x10a   :  { %v99_v23 = vmul.f32 %v827_v21, %v98_v22 }
 0x10c   :  { %v100_v24 = vmul.f32 0.5, %v99_v23 }
 0x10e   :  { %v101_v25 = vsub.f32 1.5, %v100_v24 }
 0x110   :  { %v102_v26 = vmul.f32 %v827_v21, %v101_v25 }
 0x112   :  { %v106_v28 = vsel %vm105_vm4, %v827_v21, %v102_v26 }
 0x113   :  { %v117_v29 = vmul.f32 %v106_v28, %v83_v11 }
 0x115   :  { %v123_v31 = vmul.f32 %v812_v27, %v117_v29 }
 0x117   :  { %v1026_v32 = vadd.f32 %v813_v30, %v123_v31 }
 0x119   :  { %784 = vmatmul.msk.f32.vlgmr.msra.gmra.mxu0 %vm67_vm0, %v1026_v32 }
 0x196   :  { %v162_v34 = vpop.f32.mrf.mxu0 }
 0x197   :  { %v1033_v35 = vadd.f32 %v814_v33, %v162_v34 }
 0x199   :  { %237 = vrot.lane.b32.xlu0 %v1033_v35, %s887_s26  ;;  %169 = vrot.lane.b32.xlu1 %v1033_v35, %s888_s27 }
 0x1c3   :  { %72 = vadd.xlane.f32.xlu1 %v71_v37 }
 0x20b   :  { %v170_v38 = vpop.permute.xlu1 %169  ;;  %v238_v0 = vpop.permute.xlu0 %237 }
 0x20c   :  { %786 = vmatpush.xpose.msk.msra.mxu1 %vm171_vm5, %v170_v38 }
 0x20f   :  { %787 = vmatmul.msk.f32.vlgmr.msra.gmra.mxu1 %vm171_vm5, %v1033_v35 }
 0x236   :  { %v73_v39 = vpop.xlane.xlu1 %72 }
 0x237   :  { %v82_v40 = vmul.f32 %v1003_v8, %v73_v39 }
 0x239   :  { %v84_v41 = vsub.f32 %v66_v36, %v82_v40 }
 0x23b   :  { %v86_v42 = vmul.f32 %v84_v41, %v84_v41 }
 0x23d   :  { %v90_v43 = vsel %vm67_vm0, %v86_v42, 0.0 }
 0x23e   :  { %91 = vadd.xlane.f32.xlu2 %v90_v43 }
 0x28c   :  { %v193_v44 = vpop.f32.mrf.mxu1 }
 0x28d   :  { %v196_v45 = vmul.f32 0.25, %v193_v44 }
 0x28f   :  { %v198_v46 = vsel %vm197_vm6, %v196_v45, -inf }
 0x290   :  { %199 = vmax.xlane.f32.xlu2 %v198_v46 }
 0x2a8   :  { %209 = vrot.lane.b32.xlu2 %v1033_v35, %s889_s23 }
 0x2b0   :  { %235 = vrot.lane.b32.xlu2 %v1033_v35, %s890_s29 }
 0x2b1   :  { %v92_v47 = vpop.xlane.xlu2 %91 }
 0x2b2   :  { %v94_v48 = vmul.f32 %v92_v47, %v1003_v8 }
 0x2b4   :  { %v96_v49 = vadd.f32 1e-12, %v94_v48 }
 0x2b6   :  { %828 = vrsqrt.f32 %v96_v49  ;;  %vm113_vm8 = vweird.f32 %v96_v49 }
 0x2bc   :  { %v829_v50 = vpop.eup %828 }
 0x2bd   :  { %v108_v51 = vmul.f32 %v829_v50, %v96_v49  ;;  %vm114_vm7 = vweird.f32 %v829_v50 }
 0x2be   :  { %vm115_vm9 = vmor %vm113_vm8, %vm114_vm7  ;;  %vm698_vm7 = vcmask 1040384  }
 0x2bf   :  { %v109_v52 = vmul.f32 %v829_v50, %v108_v51 }
 0x2c1   :  { %v110_v53 = vmul.f32 0.5, %v109_v52 }
 0x2c3   :  { %v111_v54 = vsub.f32 1.5, %v110_v53  ;;  %v445_v53 = vld [vmem:[%s1252_s5 + $0x18] sm:$0xff] }
 0x2c5   :  { %v112_v55 = vmul.f32 %v829_v50, %v111_v54  ;;  %v444_v54 = vld [vmem:[%s1252_s5 + $0x10] sm:$0xff] }
 0x2c7   :  { %v116_v56 = vsel %vm115_vm9, %v829_v50, %v112_v55  ;;  %v443_v55 = vld [vmem:[%s1252_s5 + $0x8] sm:$0xff] }
 0x2c8   :  { %v118_v57 = vmul.f32 %v116_v56, %v84_v41  ;;  %v442_v56 = vld [vmem:[%s1252_s5] sm:$0xff] }
 0x2ca   :  { %v124_v58 = vmul.f32 %v812_v27, %v118_v57 }
 0x2cc   :  { %v1054_v59 = vadd.f32 %v813_v30, %v124_v58 }
 0x2ce   :  { %785 = vmatmul.msk.f32.gmra.mxu0 %vm67_vm0, %v1054_v59 }
 0x303   :  { %v200_v60 = vpop.xlane.xlu2 %199 }
 0x304   :  { %v201_v61 = vsub.f32 %v196_v45, %v200_v60 }
 0x306   :  { %v202_v62 = vmul.f32 1.442695, %v201_v61 }
 0x308   :  { %830 = vpow2.f32 %v202_v62 }
 0x30b   :  { %v210_v63 = vpop.permute.xlu2 %209 }
 0x30c   :  { %230 = vmatpush.msra.mxu3 %v210_v63  ;;  %v815_v63 = vld [vmem:[%s1253_s6] ss:$0 sm:$0xff] }
 0x30e   :  { %789 = vmatpush.xpose.msk.msrb.mxu3 %vm171_vm5, %v238_v0  ;;  %v831_v1 = vpop.eup %830 }
 0x30f   :  { %v204_v2 = vsel %vm197_vm6, %v831_v1, 0.0 }
 0x310   :  { %205 = vadd.xlane.f32.xlu0 %v204_v2 }
 0x313   :  { %v236_v9 = vpop.permute.xlu2 %235 }
 0x34b   :  { %v165_v3 = vpop.f32.mrf.mxu0 }
 0x34c   :  { %v166_v4 = vadd.f32 %v814_v33, %v165_v3 }
 0x34e   :  { %307 = vrot.lane.b32.xlu1 %v166_v4, %s888_s27  ;;  %371 = vrot.lane.b32.xlu2 %v166_v4, %s890_s29 }
 0x34f   :  { %373 = vrot.lane.b32.xlu0 %v166_v4, %s887_s26 }
 0x383   :  { %v206_v5 = vpop.xlane.xlu0 %205 }
 0x384   :  { %832 = vrcp.f32 %v206_v5 }
 0x38a   :  { %v833_v6 = vpop.eup %832 }
 0x38b   :  { %v208_v7 = vmul.f32 %v833_v6, %v831_v1 }
 0x38d   :  { %788 = vmatmul.msk.f32.vlgmr.msra.gmra.mxu3 %vm197_vm6, %v208_v7 }
 0x395   :  { %790 = vmatmul.msk.f32.vlgmr.msrb.gmra.mxu3 %vm171_vm5, %v236_v9 }
 0x3a8   :  { %v372_v12 = vpop.permute.xlu2 %371 }
 0x3c0   :  { %v308_v10 = vpop.permute.xlu1 %307 }
 0x3c1   :  { %v374_v11 = vpop.permute.xlu0 %373  ;;  %792 = vmatpush.xpose.msk.msrb.mxu1 %vm171_vm5, %v308_v10 }
 0x3c2   :  { %795 = vmatpush.xpose.msk.msrb.mxu0 %vm171_vm5, %v374_v11 }
 0x3c4   :  { %793 = vmatmul.msk.f32.vlgmr.msrb.gmra.mxu1 %vm171_vm5, %v166_v4 }
 0x3c5   :  { %796 = vmatmul.msk.f32.vlgmr.msrb.gmra.mxu0 %vm171_vm5, %v372_v12 }
 0x410   :  { %v1069_v13 = vpop.f32.mrf.mxu3 }
 0x418   :  { %v260_v14 = vpop.f32.mrf.mxu3 }
 0x419   :  { %v263_v15 = vmul.f32 0.25, %v260_v14 }
 0x41b   :  { %v264_v16 = vsel %vm197_vm6, %v263_v15, -inf }
 0x41c   :  { %265 = vmax.xlane.f32.xlu0 %v264_v16 }
 0x441   :  { %v330_v17 = vpop.f32.mrf.mxu1 }
 0x442   :  { %v333_v18 = vmul.f32 0.25, %v330_v17  ;;  %v396_v19 = vpop.f32.mrf.mxu0 }
 0x443   :  { %v399_v20 = vmul.f32 0.25, %v396_v19  ;;  %v538_v19 = vld [vmem:[%s1256_s9 + $0x8] sm:$0xff] }
 0x444   :  { %v334_v21 = vsel %vm197_vm6, %v333_v18, -inf }
 0x445   :  { %335 = vmax.xlane.f32.xlu1 %v334_v21  ;;  %v400_v22 = vsel %vm197_vm6, %v399_v20, -inf }
 0x446   :  { %401 = vmax.xlane.f32.xlu2 %v400_v22 }
 0x45e   :  { %275 = vrot.lane.b32.xlu2 %v1033_v35, %s891_s30 }
 0x466   :  { %345 = vrot.lane.b32.xlu2 %v166_v4, %s889_s23 }
 0x48f   :  { %v266_v24 = vpop.xlane.xlu0 %265 }
 0x490   :  { %v267_v29 = vsub.f32 %v263_v15, %v266_v24  ;;  %v607_v24 = vld [vmem:[%s1258_s11 + $0x78] sm:$0xff] }
 0x492   :  { %v268_v31 = vmul.f32 1.442695, %v267_v29  ;;  %v604_v29 = vld [vmem:[%s1258_s11 + $0x60] sm:$0xff] }
 0x4b8   :  { %v336_v23 = vpop.xlane.xlu1 %335 }
 0x4b9   :  { %v337_v25 = vsub.f32 %v333_v18, %v336_v23  ;;  %v402_v26 = vpop.xlane.xlu2 %401  ;;  %v539_v18 = vld [vmem:[%s1256_s9 + $0x10] sm:$0xff] }
 0x4ba   :  { %v403_v27 = vsub.f32 %v399_v20, %v402_v26  ;;  %v537_v20 = vld [vmem:[%s1256_s9] sm:$0xff]  ;;  %v605_v26 = vld [vmem:[%s1258_s11 + $0x68] sm:$0xff] }
 0x4bb   :  { %v338_v28 = vmul.f32 1.442695, %v337_v25  ;;  %v606_v25 = vld [vmem:[%s1258_s11 + $0x70] sm:$0xff] }
 0x4bc   :  { %v404_v30 = vmul.f32 1.442695, %v403_v27 }
 0x4bd   :  { %834 = vpow2.f32 %v338_v28 }
 0x4be   :  { %836 = vpow2.f32 %v404_v30 }
 0x4bf   :  { %838 = vpow2.f32 %v268_v31 }
 0x4c1   :  { %v276_v33 = vpop.permute.xlu2 %275 }
 0x4c2   :  { %296 = vmatpush.msra.mxu2 %v276_v33 }
 0x4c3   :  { %v835_v34 = vpop.eup %834 }
 0x4c4   :  { %v837_v36 = vpop.eup %836  ;;  %v340_v35 = vsel %vm197_vm6, %v835_v34, 0.0  ;;  %612 = vmatpush.msrb.mxu2 %v607_v24 }
 0x4c5   :  { %341 = vadd.xlane.f32.xlu1 %v340_v35  ;;  %v406_v37 = vsel %vm197_vm6, %v837_v36, 0.0  ;;  %v839_v39 = vpop.eup %838 }
 0x4c6   :  { %407 = vadd.xlane.f32.xlu0 %v406_v37  ;;  %v270_v40 = vsel %vm197_vm6, %v839_v39, 0.0  ;;  %613 = vmatpush.msrb.mxu2 %v606_v25  ;;  %v819_v25 = vld [vmem:[%s1259_s12] ss:$0 sm:$0xff] }
 0x4c8   :  { %614 = vmatpush.msrb.mxu2 %v605_v26 }
 0x4c9   :  { %v346_v38 = vpop.permute.xlu2 %345 }
 0x4ca   :  { %366 = vmatpush.msra.mxu3 %v346_v38  ;;  %615 = vmatpush.msrb.mxu2 %v604_v29 }
 0x4cc   :  { %468 = vmatpush.msrb.mxu3 %v445_v53 }
 0x4ce   :  { %271 = vadd.xlane.f32.xlu0 %v270_v40  ;;  %469 = vmatpush.msrb.mxu3 %v444_v54  ;;  %v816_v40 = vld [vmem:[%s1254_s7] ss:$0 sm:$0xff]  ;;  %v603_v54 = vld [vmem:[%s1258_s11 + $0x58] sm:$0xff] }
 0x4cf   :  { %616 = vmatpush.msrb.mxu2 %v603_v54 }
 0x4d0   :  { %470 = vmatpush.msrb.mxu3 %v443_v55  ;;  %v602_v55 = vld [vmem:[%s1258_s11 + $0x50] sm:$0xff] }
 0x4d1   :  { %617 = vmatpush.msrb.mxu2 %v602_v55 }
 0x4d2   :  { %471 = vmatpush.msrb.mxu3 %v442_v56  ;;  %v601_v56 = vld [vmem:[%s1258_s11 + $0x48] sm:$0xff] }
 0x4d3   :  { %618 = vmatpush.msrb.mxu2 %v601_v56 }
 0x4e2   :  { %411 = vrot.lane.b32.xlu0 %v166_v4, %s891_s30 }
 0x538   :  { %v342_v41 = vpop.xlane.xlu1 %341 }
 0x539   :  { %840 = vrcp.f32 %v342_v41  ;;  %v408_v42 = vpop.xlane.xlu0 %407 }
 0x53f   :  { %v841_v43 = vpop.eup %840 }
 0x540   :  { %v344_v44 = vmul.f32 %v841_v43, %v835_v34 }
 0x541   :  { %v272_v45 = vpop.xlane.xlu0 %271 }
 0x542   :  { %842 = vrcp.f32 %v272_v45  ;;  %794 = vmatmul.msk.f32.vlgmr.msra.gmra.mxu3 %vm197_vm6, %v344_v44  ;;  %v817_v44 = vld [vmem:[%s1255_s8] ss:$0 sm:$0xff] }
 0x543   :  { %844 = vrcp.f32 %v408_v42 }
 0x548   :  { %v843_v46 = vpop.eup %842 }
 0x549   :  { %v274_v47 = vmul.f32 %v843_v46, %v839_v39  ;;  %v845_v48 = vpop.eup %844 }
 0x54a   :  { %v410_v49 = vmul.f32 %v845_v48, %v837_v36 }
 0x54b   :  { %791 = vmatmul.msk.f32.vlgmr.msra.gmra.mxu2 %vm197_vm6, %v274_v47 }
 0x554   :  { %v412_v50 = vpop.permute.xlu0 %411 }
 0x555   :  { %432 = vmatpush.msra.mxu1 %v412_v50 }
 0x556   :  { %797 = vmatmul.msk.f32.vlgmr.msra.gmra.mxu1 %vm197_vm6, %v410_v49 }
 0x5c5   :  { %v368_v61 = vpop.f32.mrf.mxu3 }
 0x5ce   :  { %v298_v51 = vpop.f32.mrf.mxu2 }
 0x5cf   :  { %302 = vrot.lane.b32.xlu1 %v298_v51, %s892_s0 }
 0x5d3   :  { %v434_v52 = vpop.f32.mrf.mxu1 }
 0x5d4   :  { %438 = vrot.lane.b32.xlu2 %v434_v52, %s892_s0  ;;  %s893_s0 = smov [#allocation2]  }
 0x5d5   :  { %s771_s21 = sshll.u32 %s893_s0, 4  ;;  %s772_s21 = int_to_ptr.vmem [resolvable:$true] %s771_s21 }
 0x62e   :  { %v439_v60 = vpop.permute.xlu2 %438 }
 0x62f   :  { %v441_v62 = vsel %vm171_vm5, %v368_v61, %v439_v60  ;;  %v598_v60 = vld [vmem:[%s1258_s11 + $0x30] sm:$0xff]  ;;  %v597_v61 = vld [vmem:[%s1258_s11 + $0x28] sm:$0xff] }
 0x641   :  { %v303_v57 = vpop.permute.xlu1 %302 }
 0x642   :  { %v305_v58 = vsel %vm171_vm5, %v1069_v13, %v303_v57  ;;  %v600_v57 = vld [vmem:[%s1258_s11 + $0x40] sm:$0xff] }
 0x643   :  { %798 = vmatmul.msk.f32.vlgmr.msrb.gmra.mxu3 %vm67_vm0, %v305_v58  ;;  %619 = vmatpush.msrb.mxu2 %v600_v57  ;;  %v599_v58 = vld [vmem:[%s1258_s11 + $0x38] sm:$0xff] }
 0x645   :  { %620 = vmatpush.msrb.mxu2 %v599_v58 }
 0x647   :  { %621 = vmatpush.msrb.mxu2 %v598_v60 }
 0x649   :  { %622 = vmatpush.msrb.mxu2 %v597_v61 }
 0x64b   :  { %799 = vmatmul.msk.f32.gmra.mxu3 %vm67_vm0, %v441_v62  ;;  %v596_v62 = vld [vmem:[%s1258_s11 + $0x20] sm:$0xff] }
 0x64c   :  { %623 = vmatpush.msrb.mxu2 %v596_v62 }
 0x6c6   :  { %v473_v0 = vpop.f32.mrf.mxu3 }
 0x6c7   :  { %v474_v1 = vadd.f32 %v815_v63, %v473_v0  ;;  %v594_v0 = vld [vmem:[%s1258_s11 + $0x10] sm:$0xff] }
 0x6c9   :  { %v479_v2 = vadd.f32 %v474_v1, %v1026_v32  ;;  %v593_v1 = vld [vmem:[%s1258_s11 + $0x8] sm:$0xff] }
 0x6cb   :  { %v481_v3 = vsel %vm67_vm0, %v479_v2, 0.0 }
 0x6cc   :  { %482 = vadd.xlane.f32.xlu0 %v481_v3  ;;  %v818_v3 = vld [vmem:[%s1257_s10] ss:$0 sm:$0xff] }
 0x6ce   :  { %v476_v4 = vpop.f32.mrf.mxu3 }
 0x6cf   :  { %v477_v5 = vadd.f32 %v815_v63, %v476_v4  ;;  %v595_v63 = vld [vmem:[%s1258_s11 + $0x18] sm:$0xff] }
 0x6d0   :  { %624 = vmatpush.msrb.mxu2 %v595_v63 }
 0x6d1   :  { %v480_v6 = vadd.f32 %v477_v5, %v1054_v59  ;;  %v540_v59 = vld [vmem:[%s1256_s9 + $0x18] sm:$0xff] }
 0x6d2   :  { %563 = vmatpush.msra.mxu0 %v540_v59  ;;  %625 = vmatpush.msrb.mxu2 %v594_v0  ;;  %v820_v0 = vld [vmem:[%s1260_s13] ss:$0 sm:$0xff] }
 0x6d3   :  { %v484_v7 = vsel %vm67_vm0, %v480_v6, 0.0 }
 0x6d4   :  { %485 = vadd.xlane.f32.xlu2 %v484_v7  ;;  %564 = vmatpush.msra.mxu0 %v539_v18 }
 0x6d5   :  { %626 = vmatpush.msrb.mxu2 %v593_v1 }
 0x6d6   :  { %565 = vmatpush.msra.mxu0 %v538_v19 }
 0x6d8   :  { %566 = vmatpush.msra.mxu0 %v537_v20 }
 0x73f   :  { %v483_v9 = vpop.xlane.xlu0 %482 }
 0x740   :  { %v487_v10 = vmul.f32 %v483_v9, %v1003_v8 }
 0x742   :  { %v489_v11 = vsub.f32 %v479_v2, %v487_v10  ;;  %v592_v2 = vld [vmem:[%s1258_s11] sm:$0xff] }
 0x743   :  { %627 = vmatpush.msrb.mxu2 %v592_v2 }
 0x744   :  { %v491_v12 = vmul.f32 %v489_v11, %v489_v11 }
 0x746   :  { %v493_v13 = vsel %vm67_vm0, %v491_v12, 0.0 }
 0x747   :  { %494 = vadd.xlane.f32.xlu1 %v493_v13  ;;  %v486_v14 = vpop.xlane.xlu2 %485 }
 0x748   :  { %v488_v32 = vmul.f32 %v486_v14, %v1003_v8 }
 0x74a   :  { %v490_v15 = vsub.f32 %v480_v6, %v488_v32 }
 0x74c   :  { %v492_v16 = vmul.f32 %v490_v15, %v490_v15 }
 0x74e   :  { %v496_v17 = vsel %vm67_vm0, %v492_v16, 0.0 }
 0x74f   :  { %497 = vadd.xlane.f32.xlu0 %v496_v17 }
 0x7ba   :  { %v495_v21 = vpop.xlane.xlu1 %494 }
 0x7bb   :  { %v499_v22 = vmul.f32 %v495_v21, %v1003_v8 }
 0x7bd   :  { %v501_v23 = vadd.f32 1e-12, %v499_v22 }
 0x7bf   :  { %846 = vrsqrt.f32 %v501_v23  ;;  %vm509_vm11 = vweird.f32 %v501_v23 }
 0x7c2   :  { %v498_v27 = vpop.xlane.xlu0 %497 }
 0x7c3   :  { %v500_v28 = vmul.f32 %v498_v27, %v1003_v8 }
 0x7c5   :  { %v847_v30 = vpop.eup %846  ;;  %v502_v31 = vadd.f32 1e-12, %v500_v28 }
 0x7c6   :  { %v504_v33 = vmul.f32 %v847_v30, %v501_v23  ;;  %vm510_vm10 = vweird.f32 %v847_v30 }
 0x7c7   :  { %848 = vrsqrt.f32 %v502_v31  ;;  %vm511_vm12 = vmor %vm509_vm11, %vm510_vm10  ;;  %vm519_vm14 = vweird.f32 %v502_v31 }
 0x7c8   :  { %v505_v34 = vmul.f32 %v847_v30, %v504_v33 }
 0x7ca   :  { %v506_v36 = vmul.f32 0.5, %v505_v34 }
 0x7cc   :  { %v507_v35 = vsub.f32 1.5, %v506_v36 }
 0x7cd   :  { %v849_v37 = vpop.eup %848 }
 0x7ce   :  { %v508_v38 = vmul.f32 %v847_v30, %v507_v35  ;;  %v514_v39 = vmul.f32 %v849_v37, %v502_v31  ;;  %vm520_vm13 = vweird.f32 %v849_v37 }
 0x7cf   :  { %vm521_vm15 = vmor %vm519_vm14, %vm520_vm13 }
 0x7d0   :  { %v512_v41 = vsel %vm511_vm12, %v847_v30, %v508_v38  ;;  %v515_v42 = vmul.f32 %v849_v37, %v514_v39 }
 0x7d1   :  { %v523_v43 = vmul.f32 %v512_v41, %v489_v11 }
 0x7d2   :  { %v516_v45 = vmul.f32 0.5, %v515_v42 }
 0x7d3   :  { %v529_v46 = vmul.f32 %v816_v40, %v523_v43 }
 0x7d4   :  { %v517_v47 = vsub.f32 1.5, %v516_v45 }
 0x7d5   :  { %v1142_v48 = vadd.f32 %v817_v44, %v529_v46  ;;  %v703_v46 = vld [vmem:[%s1262_s15 + $0x18] sm:$0xff] }
 0x7d6   :  { %v518_v49 = vmul.f32 %v849_v37, %v517_v47  ;;  %723 = vmatpush.msrb.mxu1 %v703_v46 }
 0x7d7   :  { %800 = vmatmul.msk.f32.vlgmr.msra.gmra.mxu0 %vm67_vm0, %v1142_v48 }
 0x7d8   :  { %v522_v50 = vsel %vm521_vm15, %v849_v37, %v518_v49  ;;  %v701_v49 = vld [vmem:[%s1262_s15 + $0x8] sm:$0xff] }
 0x7d9   :  { %v524_v51 = vmul.f32 %v522_v50, %v490_v15 }
 0x7db   :  { %v530_v52 = vmul.f32 %v816_v40, %v524_v51  ;;  %v700_v51 = vld [vmem:[%s1262_s15] sm:$0xff] }
 0x7dd   :  { %v536_v53 = vadd.f32 %v817_v44, %v530_v52 }
 0x7df   :  { %801 = vmatmul.msk.f32.gmra.mxu0 %vm67_vm0, %v536_v53 }
 0x854   :  { %v568_v4 = vpop.f32.mrf.mxu0 }
 0x855   :  { %v569_v5 = vadd.f32 %v818_v3, %v568_v4 }
 0x857   :  { %v576_v6 = vmul.f32 0.044715, %v569_v5  ;;  %v574_v18 = vmul.f32 0.5, %v569_v5 }
 0x859   :  { %v578_v7 = vmul.f32 %v576_v6, %v569_v5 }
 0x85b   :  { %v580_v9 = vmul.f32 %v578_v7, %v569_v5 }
 0x85c   :  { %v571_v10 = vpop.f32.mrf.mxu0 }
 0x85d   :  { %v572_v11 = vadd.f32 %v818_v3, %v571_v10  ;;  %v582_v12 = vadd.f32 %v580_v9, %v569_v5  ;;  %v821_v3 = vld [vmem:[%s1261_s14] ss:$0 sm:$0xff] }
 0x85f   :  { %v584_v13 = vmul.f32 0.7978846, %v582_v12  ;;  %v577_v14 = vmul.f32 0.044715, %v572_v11  ;;  %v575_v22 = vmul.f32 0.5, %v572_v11 }
 0x861   :  { %850 = vtanh.f32 %v584_v13  ;;  %v579_v32 = vmul.f32 %v577_v14, %v572_v11 }
 0x863   :  { %v581_v15 = vmul.f32 %v579_v32, %v572_v11 }
 0x865   :  { %v583_v16 = vadd.f32 %v581_v15, %v572_v11  ;;  %v735_v15 = vld [vmem:[%s1264_s17 + $0x18] sm:$0xff] }
 0x867   :  { %v851_v17 = vpop.eup %850  ;;  %v585_v59 = vmul.f32 0.7978846, %v583_v16  ;;  %v734_v16 = vld [vmem:[%s1264_s17 + $0x10] sm:$0xff] }
 0x868   :  { %v588_v19 = vadd.f32 1.0, %v851_v17  ;;  %v733_v17 = vld [vmem:[%s1264_s17 + $0x8] sm:$0xff] }
 0x869   :  { %852 = vtanh.f32 %v585_v59  ;;  %v732_v59 = vld [vmem:[%s1264_s17] sm:$0xff] }
 0x86a   :  { %v590_v20 = vmul.f32 %v588_v19, %v574_v18  ;;  %v822_v18 = vld [vmem:[%s1263_s16] ss:$0 sm:$0xff] }
 0x86c   :  { %628 = vmatmul.f32.vlgmr.msrb.gmra.mxu2 %v590_v20 }
 0x86f   :  { %v853_v21 = vpop.eup %852 }
 0x870   :  { %v589_v23 = vadd.f32 1.0, %v853_v21 }
 0x872   :  { %v591_v24 = vmul.f32 %v589_v23, %v575_v22  ;;  %v823_v22 = vld [vmem:[%s1265_s18] ss:$0 sm:$0xff] }
 0x874   :  { %631 = vmatmul.f32.gmra.mxu2 %v591_v24 }
 0x8ef   :  { %v629_v26 = vpop.f32.mrf.mxu2 }
 0x8f0   :  { %v630_v27 = vadd.f32 %v819_v25, %v629_v26 }
 0x8f2   :  { %v635_v28 = vadd.f32 %v630_v27, %v1142_v48  ;;  %v702_v48 = vld [vmem:[%s1262_s15 + $0x10] sm:$0xff] }
 0x8f3   :  { %724 = vmatpush.msrb.mxu1 %v702_v48 }
 0x8f4   :  { %v637_v29 = vsel %vm67_vm0, %v635_v28, 0.0 }
 0x8f5   :  { %638 = vadd.xlane.f32.xlu0 %v637_v29  ;;  %725 = vmatpush.msrb.mxu1 %v701_v49 }
 0x8f7   :  { %v632_v30 = vpop.f32.mrf.mxu2  ;;  %726 = vmatpush.msrb.mxu1 %v700_v51 }
 0x8f8   :  { %v633_v31 = vadd.f32 %v819_v25, %v632_v30 }
 0x8f9   :  { %755 = vmatpush.msra.mxu1 %v735_v15 }
 0x8fa   :  { %v636_v33 = vadd.f32 %v633_v31, %v536_v53 }
 0x8fb   :  { %756 = vmatpush.msra.mxu1 %v734_v16 }
 0x8fc   :  { %v640_v34 = vsel %vm67_vm0, %v636_v33, 0.0 }
 0x8fd   :  { %641 = vadd.xlane.f32.xlu2 %v640_v34  ;;  %757 = vmatpush.msra.mxu1 %v733_v17 }
 0x8ff   :  { %758 = vmatpush.msra.mxu1 %v732_v59 }
 0x968   :  { %v639_v36 = vpop.xlane.xlu0 %638 }
 0x969   :  { %v643_v35 = vmul.f32 %v639_v36, %v1003_v8 }
 0x96b   :  { %v645_v37 = vsub.f32 %v635_v28, %v643_v35 }
 0x96d   :  { %v647_v38 = vmul.f32 %v645_v37, %v645_v37 }
 0x96f   :  { %v649_v39 = vsel %vm67_vm0, %v647_v38, 0.0 }
 0x970   :  { %v642_v40 = vpop.xlane.xlu2 %641  ;;  %650 = vadd.xlane.f32.xlu0 %v649_v39 }
 0x971   :  { %v644_v41 = vmul.f32 %v642_v40, %v1003_v8 }
 0x973   :  { %v646_v42 = vsub.f32 %v636_v33, %v644_v41 }
 0x975   :  { %v648_v43 = vmul.f32 %v646_v42, %v646_v42 }
 0x977   :  { %v652_v44 = vsel %vm67_vm0, %v648_v43, 0.0 }
 0x978   :  { %653 = vadd.xlane.f32.xlu2 %v652_v44 }
 0x9e3   :  { %v651_v45 = vpop.xlane.xlu0 %650 }
 0x9e4   :  { %v655_v47 = vmul.f32 %v651_v45, %v1003_v8 }
 0x9e6   :  { %v657_v50 = vadd.f32 1e-12, %v655_v47 }
 0x9e8   :  { %854 = vrsqrt.f32 %v657_v50  ;;  %vm665_vm2 = vweird.f32 %v657_v50 }
 0x9eb   :  { %v654_v52 = vpop.xlane.xlu2 %653 }
 0x9ec   :  { %v656_v53 = vmul.f32 %v654_v52, %v1003_v8 }
 0x9ee   :  { %v855_v54 = vpop.eup %854  ;;  %v658_v55 = vadd.f32 1e-12, %v656_v53 }
 0x9ef   :  { %v660_v56 = vmul.f32 %v855_v54, %v657_v50  ;;  %vm666_vm1 = vweird.f32 %v855_v54 }
 0x9f0   :  { %856 = vrsqrt.f32 %v658_v55  ;;  %vm667_vm3 = vmor %vm665_vm2, %vm666_vm1  ;;  %vm675_vm5 = vweird.f32 %v658_v55 }
 0x9f1   :  { %v661_v57 = vmul.f32 %v855_v54, %v660_v56 }
 0x9f3   :  { %v662_v58 = vmul.f32 0.5, %v661_v57 }
 0x9f5   :  { %v663_v60 = vsub.f32 1.5, %v662_v58 }
 0x9f6   :  { %v857_v61 = vpop.eup %856 }
 0x9f7   :  { %v664_v62 = vmul.f32 %v855_v54, %v663_v60  ;;  %v670_v63 = vmul.f32 %v857_v61, %v658_v55  ;;  %vm676_vm4 = vweird.f32 %v857_v61 }
 0x9f8   :  { %vm677_vm6 = vmor %vm675_vm5, %vm676_vm4 }
 0x9f9   :  { %v668_v1 = vsel %vm667_vm3, %v855_v54, %v664_v62  ;;  %v671_v2 = vmul.f32 %v857_v61, %v670_v63 }
 0x9fa   :  { %v679_v8 = vmul.f32 %v668_v1, %v645_v37 }
 0x9fb   :  { %v672_v4 = vmul.f32 0.5, %v671_v2 }
 0x9fc   :  { %v685_v5 = vmul.f32 %v820_v0, %v679_v8 }
 0x9fd   :  { %v673_v6 = vsub.f32 1.5, %v672_v4 }
 0x9fe   :  { %v691_v7 = vadd.f32 %v821_v3, %v685_v5 }
 0x9ff   :  { %v674_v9 = vmul.f32 %v857_v61, %v673_v6 }
 0xa00   :  { %693 = vst.msk [vmem:[%s1266_s19] sm:$0xff] %vm67_vm0, %v691_v7 }
 0xa01   :  { %v678_v10 = vsel %vm677_vm6, %v857_v61, %v674_v9 }
 0xa02   :  { %v680_v11 = vmul.f32 %v678_v10, %v646_v42 }
 0xa04   :  { %v686_v12 = vmul.f32 %v820_v0, %v680_v11 }
 0xa06   :  { %v692_v13 = vadd.f32 %v821_v3, %v686_v12 }
 0xa08   :  { %694 = vst.msk [vmem:[%s1266_s19 + $0x8] sm:$0xff] %vm67_vm0, %v692_v13  ;;  %v696_v14 = vrot.slane %v692_v13, 7 }
 0xa0a   :  { %v699_v32 = vsel %vm698_vm7, %v691_v7, %v696_v14 }
 0xa0b   :  { %802 = vmatmul.msk.f32.vlgmr.msrb.gmra.mxu1 %vm67_vm0, %v699_v32 }
 0xa88   :  { %v728_v19 = vpop.f32.mrf.mxu1 }
 0xa89   :  { %v729_v20 = vadd.f32 %v822_v18, %v728_v19 }
 0xa8b   :  { %858 = vtanh.f32 %v729_v20 }
 0xa91   :  { %v859_v21 = vpop.eup %858 }
 0xa92   :  { %803 = vmatmul.msk.f32.vlgmr.msra.gmra.mxu1 %vm67_vm0, %v859_v21 }
 0xb0f   :  { %v760_v23 = vpop.f32.mrf.mxu1 }
 0xb10   :  { %v761_v24 = vadd.f32 %v823_v22, %v760_v23 }
 0xb12   :  { %763 = vst [vmem:[#allocation2] sm:$0x3] %v761_v24 }
 0xb13   :  { %776 = dma.vmem_to_hbm [thread:$0]  %s772_s21, 32, %s774_s22, [#allocation3]  }
 0xb14   :  { %884 = dma.done.wait [#allocation3], 32  }
 0xb15   :  { %885 = vsyncadd [#allocation3], 4294967264 }
 0xb16   :  { %783 = vsyncpa [#allocation3], 1 }

// kernel: pretrain_bert_forward.3
= control target key start
LH: loop header
LB: loop body
LE: loop exit
PB: predicated region body
PF: predicated region fallthrough
CT: control target
= control target key end

     0   :  { %8 = vsyncpa [#allocation3], 0  ;;  %s1939_s0 = inlined_call_operand.vmem [shape: f32[16,32], index: 0, kind: input, shape index: {}]   ;;  %s1940_s1 = inlined_call_operand.vmem [shape: bf16[8,32,3840], index: 1, kind: input, shape index: {}]   ;;  %s1941_s2 = inlined_call_operand.vmem [shape: f32[1,30720], index: 2, kind: input, shape index: {}]   ;;  %s1942_s3 = inlined_call_operand.hbm [shape: f32[16,30522], index: 3, kind: output, shape index: {}]  }
   0x1   :  { %10 = vsyncpa [#allocation3 + $0x1], 0  ;;  %s1519_s12 = smov 0   ;;  %s1521_s13 = smov 0  }
   0x2   :  { %s1523_s14 = smov 0   ;;  %s1525_s15 = smov 0  }
   0x3 LB: > { %s1540_s16 = sadd.s32 4294967295, %s1494_s15   ;;  %s1295_s17 = sadd.s32 4294967294, %s1494_s15   ;;  %s1494_s15 = sphi %s1525_s15, %s1949_s15   ;;  %s1490_s14 = sphi %s1523_s14, %s1948_s14   ;;  %s1486_s13 = sphi %s1521_s13, %s1947_s13   ;;  %s1482_s12 = sphi %s1519_s12, %s1946_s12  }
   0x4   : > { %s1544_s18 = sadd.s32 1, %s1494_s15   ;;  %s96_s19 = sadd.s32 1, %s1490_s14 }
   0x5   : > { %s93_s20 = ssub.s32 %s1494_s15, %s1544_s18  ;;  %p106_p0 = scmp.ne.s32.totalorder %s1490_s14, %s1486_s13 }
   0x6   : > { %p94_p1 = scmp.eq.s32.totalorder %s93_s20, 0  ;;  %p107_p2 = scmp.eq.s32.totalorder %s1540_s16, 7 }
   0x7   : > { %p112_p3 = scmp.ne.s32.totalorder %s1486_s13, %s1482_s12  ;;  %p113_p4 = scmp.eq.s32.totalorder %s1295_s17, 7 }
   0x8   : > { %s1555_s21 = scalar_select %p94_p1, %s1490_s14, %s96_s19  }
   0x9   : > { %p1557_p5 = por %p107_p2, %p106_p0  ;;  %p1561_p6 = por %p113_p4, %p112_p3 }
   0xa   : > { %p1298_p7 = scmp.ge.s32.totalorder %s1494_s15, 1  ;;  %p150_p8 = scmp.lt.s32.totalorder %s1494_s15, 9 }
   0xc   : > { %p151_p9 = pnand %p1298_p7, %p150_p8 }
   0xd   : > { %p178_p10 = scmp.lt.s32.totalorder (!%p151_p9), %s1540_s16, 7  ;;  %s175_s6 = sand.u32 (!%p151_p9), 1, %s1486_s13  }
   0xe   : > { %154 = sbr.rel (%p151_p9) target bundleno = 316 (0x13c), region = 32  ;;  %s1875_s20 = scalar_lea.sflag (!%p151_p9), [#allocation3], %s175_s6 }
   0xf   : > { %s1754_s7 = smul.u32 (!%p151_p9), 30, %s1540_s16 }
  0x10   : > { %s1379_s17 = smul.u32 (!%p151_p9), 480, %s175_s6 }
  0x11   : > { %p184_p11 = scmp.lt.s32.totalorder (!%p151_p9), %s1754_s7, 239 }
  0x12   : > { %s1782_s19 = scalar_lea.vmem (!%p151_p9), [#allocation2], %s1379_s17 }
  0x13   : > { %s179_s24 = scalar_select %p178_p10, %s1540_s16, 7  ;;  %v1583_v14 = vld [vmem:[%s1939_s0 + $0x8] sm:$0xff]  ;;  %vm443_vm0 = vcmask 261120   ;;  %v1595_v24 = vld [vmem:[%s1939_s0] sm:$0xff] }
  0x14   : > { %s185_s8 = scalar_select %p184_p11, %s1754_s7, 239 }
  0x15   : > { %s1380_s25 = smul.u32 480, %s179_s24  ;;  %s1209_s24 = ssub.s32 (%p1557_p5), 239, %s1754_s7 }
  0x16   : > { %s1773_s11 = scalar_lea.vmem %s1941_s2, %s185_s8  ;;  %p1210_p12 = scmp.lt.s32.totalorder (%p1557_p5), %s1209_s24, 30 }
  0x17   : > { %s1572_s28 = scalar_lea.vmem %s1940_s1, %s1380_s25 }
  0x18   : > { %v238_v0 = vld [vmem:[%s1572_s28 + $0x168] sm:$0xff]  ;;  %v223_v1 = vld [vmem:[%s1572_s28 + $0xf0] sm:$0xff]  ;;  %v208_v2 = vld [vmem:[%s1572_s28 + $0x78] sm:$0xff] }
  0x19   : > { %v343_v3 = vunpack.c.l.bf16 %v238_v0  ;;  %v344_v4 = vunpack.c.h.bf16 %v238_v0  ;;  %v313_v5 = vunpack.c.l.bf16 %v223_v1  ;;  %v314_v6 = vunpack.c.h.bf16 %v223_v1  ;;  %v193_v7 = vld [vmem:[%s1572_s28] sm:$0xff]  ;;  %v239_v10 = vld [vmem:[%s1572_s28 + $0x170] sm:$0xff]  ;;  %v224_v13 = vld [vmem:[%s1572_s28 + $0xf8] sm:$0xff] }
  0x1a   : > { %v283_v8 = vunpack.c.l.bf16 %v208_v2  ;;  %v284_v9 = vunpack.c.h.bf16 %v208_v2  ;;  %v253_v11 = vunpack.c.l.bf16 %v193_v7  ;;  %v254_v12 = vunpack.c.h.bf16 %v193_v7  ;;  %v209_v17 = vld [vmem:[%s1572_s28 + $0x80] sm:$0xff]  ;;  %v240_v20 = vld [vmem:[%s1572_s28 + $0x178] sm:$0xff]  ;;  %v194_v21 = vld [vmem:[%s1572_s28 + $0x8] sm:$0xff] }
  0x1b   : > { %1371 = vmatpush.msra.mxu2 %v343_v3  ;;  %1375 = vmatpush.msra.mxu3 %v344_v4  ;;  %v345_v15 = vunpack.c.l.bf16 %v239_v10  ;;  %v346_v16 = vunpack.c.h.bf16 %v239_v10  ;;  %v315_v18 = vunpack.c.l.bf16 %v224_v13  ;;  %v316_v19 = vunpack.c.h.bf16 %v224_v13  ;;  %v225_v27 = vld [vmem:[%s1572_s28 + $0x100] sm:$0xff]  ;;  %v210_v31 = vld [vmem:[%s1572_s28 + $0x88] sm:$0xff]  ;;  %v195_v37 = vld [vmem:[%s1572_s28 + $0x10] sm:$0xff] }
  0x1c   : > { %462 = vmatpush.msra.mxu0 %v343_v3  ;;  %485 = vmatpush.msra.mxu1 %v344_v4  ;;  %v285_v22 = vunpack.c.l.bf16 %v209_v17  ;;  %v286_v23 = vunpack.c.h.bf16 %v209_v17  ;;  %v347_v25 = vunpack.c.l.bf16 %v240_v20  ;;  %v348_v26 = vunpack.c.h.bf16 %v240_v20  ;;  %v241_v30 = vld [vmem:[%s1572_s28 + $0x180] sm:$0xff]  ;;  %v226_v34 = vld [vmem:[%s1572_s28 + $0x108] sm:$0xff]  ;;  %v211_v45 = vld [vmem:[%s1572_s28 + $0x90] sm:$0xff] }
  0x1d   : > { %1372 = vmatpush.msra.mxu2 %v313_v5  ;;  %1376 = vmatpush.msra.mxu3 %v314_v6  ;;  %v255_v28 = vunpack.c.l.bf16 %v194_v21  ;;  %v256_v29 = vunpack.c.h.bf16 %v194_v21  ;;  %v317_v32 = vunpack.c.l.bf16 %v225_v27  ;;  %v318_v33 = vunpack.c.h.bf16 %v225_v27  ;;  %v242_v42 = vld [vmem:[%s1572_s28 + $0x188] sm:$0xff]  ;;  %v227_v48 = vld [vmem:[%s1572_s28 + $0x110] sm:$0xff]  ;;  %v196_v49 = vld [vmem:[%s1572_s28 + $0x18] sm:$0xff] }
  0x1e   : > { %463 = vmatpush.msra.mxu0 %v313_v5  ;;  %486 = vmatpush.msra.mxu1 %v314_v6  ;;  %v349_v35 = vunpack.c.l.bf16 %v241_v30  ;;  %v350_v36 = vunpack.c.h.bf16 %v241_v30  ;;  %v287_v38 = vunpack.c.l.bf16 %v210_v31  ;;  %v288_v39 = vunpack.c.h.bf16 %v210_v31  ;;  %v212_v52 = vld [vmem:[%s1572_s28 + $0x98] sm:$0xff]  ;;  %v243_v55 = vld [vmem:[%s1572_s28 + $0x190] sm:$0xff]  ;;  %v197_v60 = vld [vmem:[%s1572_s28 + $0x20] sm:$0xff] }
  0x1f   : > { %1373 = vmatpush.msra.mxu2 %v283_v8  ;;  %1377 = vmatpush.msra.mxu3 %v284_v9  ;;  %v319_v40 = vunpack.c.l.bf16 %v226_v34  ;;  %v320_v41 = vunpack.c.h.bf16 %v226_v34  ;;  %v257_v43 = vunpack.c.l.bf16 %v195_v37  ;;  %v258_v44 = vunpack.c.h.bf16 %v195_v37  ;;  %v228_v63 = vld [vmem:[%s1572_s28 + $0x118] sm:$0xff]  ;;  %v213_v3 = vld [vmem:[%s1572_s28 + $0xa0] sm:$0xff]  ;;  %v199_v21 = vld [vmem:[%s1572_s28 + $0x30] sm:$0xff] }
  0x20   : > { %464 = vmatpush.msra.mxu0 %v283_v8  ;;  %487 = vmatpush.msra.mxu1 %v284_v9  ;;  %v351_v46 = vunpack.c.l.bf16 %v242_v42  ;;  %v352_v47 = vunpack.c.h.bf16 %v242_v42  ;;  %v289_v50 = vunpack.c.l.bf16 %v211_v45  ;;  %v290_v51 = vunpack.c.h.bf16 %v211_v45  ;;  %v244_v2 = vld [vmem:[%s1572_s28 + $0x198] sm:$0xff]  ;;  %v229_v6 = vld [vmem:[%s1572_s28 + $0x120] sm:$0xff]  ;;  %v198_v9 = vld [vmem:[%s1572_s28 + $0x28] sm:$0xff] }
  0x21   : > { %1374 = vmatpush.msra.mxu2 %v253_v11  ;;  %1378 = vmatpush.msra.mxu3 %v254_v12  ;;  %v321_v53 = vunpack.c.l.bf16 %v227_v48  ;;  %v322_v54 = vunpack.c.h.bf16 %v227_v48  ;;  %v259_v56 = vunpack.c.l.bf16 %v196_v49  ;;  %v260_v57 = vunpack.c.h.bf16 %v196_v49  ;;  %v231_v34 = vld [vmem:[%s1572_s28 + $0x130] sm:$0xff]  ;;  %v200_v37 = vld [vmem:[%s1572_s28 + $0x38] sm:$0xff] }
  0x22   : > { %1301 = vmatmul.msk.f32.vlgmr.msra.gmra.mxu2 %vm443_vm0, %v1583_v14  ;;  %1303 = vmatmul.msk.f32.vlgmr.msra.gmra.mxu3 %vm443_vm0, %v1583_v14  ;;  %v291_v58 = vunpack.c.l.bf16 %v212_v52  ;;  %v292_v59 = vunpack.c.h.bf16 %v212_v52  ;;  %v353_v61 = vunpack.c.l.bf16 %v243_v55  ;;  %v354_v62 = vunpack.c.h.bf16 %v243_v55  ;;  %v248_v52 = vld [vmem:[%s1572_s28 + $0x1b8] sm:$0xff]  ;;  %v217_v55 = vld [vmem:[%s1572_s28 + $0xc0] sm:$0xff] }
  0x23   : > { %508 = vmatpush.msrb.mxu2 %v345_v15  ;;  %531 = vmatpush.msrb.mxu3 %v346_v16  ;;  %v261_v0 = vunpack.c.l.bf16 %v197_v60  ;;  %v262_v1 = vunpack.c.h.bf16 %v197_v60  ;;  %v323_v4 = vunpack.c.l.bf16 %v228_v63  ;;  %v324_v5 = vunpack.c.h.bf16 %v228_v63  ;;  %v214_v15 = vld [vmem:[%s1572_s28 + $0xa8] sm:$0xff] }
  0x24   : > { %465 = vmatpush.msra.mxu0 %v253_v11  ;;  %488 = vmatpush.msra.mxu1 %v254_v12  ;;  %v355_v7 = vunpack.c.l.bf16 %v244_v2  ;;  %v356_v8 = vunpack.c.h.bf16 %v244_v2  ;;  %v293_v10 = vunpack.c.l.bf16 %v213_v3  ;;  %v294_v11 = vunpack.c.h.bf16 %v213_v3 }
  0x25   : > { %509 = vmatpush.msrb.mxu2 %v315_v18  ;;  %532 = vmatpush.msrb.mxu3 %v316_v19  ;;  %v325_v12 = vunpack.c.l.bf16 %v229_v6  ;;  %v326_v13 = vunpack.c.h.bf16 %v229_v6  ;;  %v263_v16 = vunpack.c.l.bf16 %v198_v9  ;;  %v264_v17 = vunpack.c.h.bf16 %v198_v9  ;;  %v245_v18 = vld [vmem:[%s1572_s28 + $0x1a0] sm:$0xff]  ;;  %v234_v9 = vld [vmem:[%s1572_s28 + $0x148] sm:$0xff] }
  0x26   : > { %1300 = vmatmul.msk.f32.vlgmr.msra.gmra.mxu0 %vm443_vm0, %v1595_v24  ;;  %1302 = vmatmul.msk.f32.vlgmr.msra.gmra.mxu1 %vm443_vm0, %v1595_v24  ;;  %v295_v19 = vunpack.c.l.bf16 %v214_v15  ;;  %v296_v20 = vunpack.c.h.bf16 %v214_v15  ;;  %v265_v27 = vunpack.c.l.bf16 %v199_v21  ;;  %v267_v42 = vunpack.c.l.bf16 %v200_v37  ;;  %v249_v6 = vld [vmem:[%s1572_s28 + $0x1c0] sm:$0xff] }
  0x27   : > { %510 = vmatpush.msrb.mxu2 %v285_v22  ;;  %533 = vmatpush.msrb.mxu3 %v286_v23  ;;  %v230_v22 = vld [vmem:[%s1572_s28 + $0x128] sm:$0xff]  ;;  %v357_v23 = vunpack.c.l.bf16 %v245_v18  ;;  %v301_v60 = vunpack.c.l.bf16 %v217_v55  ;;  %v336_v15 = vunpack.c.h.bf16 %v234_v9 }
  0x28   : > { %554 = vmatpush.msrb.mxu0 %v347_v25  ;;  %577 = vmatpush.msrb.mxu1 %v348_v26  ;;  %v358_v25 = vunpack.c.h.bf16 %v245_v18  ;;  %v246_v26 = vld [vmem:[%s1572_s28 + $0x1a8] sm:$0xff]  ;;  %v327_v30 = vunpack.c.l.bf16 %v230_v22  ;;  %v328_v31 = vunpack.c.h.bf16 %v230_v22  ;;  %v204_v22 = vld [vmem:[%s1572_s28 + $0x58] sm:$0xff] }
  0x29   : > { %511 = vmatpush.msrb.mxu2 %v255_v28  ;;  %534 = vmatpush.msrb.mxu3 %v256_v29  ;;  %v266_v28 = vunpack.c.h.bf16 %v199_v21  ;;  %v215_v29 = vld [vmem:[%s1572_s28 + $0xb0] sm:$0xff] }
  0x2a   : > { %1304 = vmatmul.msk.f32.vlgmr.msrb.gmra.mxu2 %vm443_vm0, %v1595_v24  ;;  %1306 = vmatmul.msk.f32.vlgmr.msrb.gmra.mxu3 %vm443_vm0, %v1595_v24 }
  0x2b   : > { %555 = vmatpush.msrb.mxu0 %v317_v32  ;;  %578 = vmatpush.msrb.mxu1 %v318_v33  ;;  %v359_v32 = vunpack.c.l.bf16 %v246_v26  ;;  %v360_v33 = vunpack.c.h.bf16 %v246_v26 }
  0x2c   : > { %600 = vmatpush.msra.mxu2 %v349_v35  ;;  %623 = vmatpush.msra.mxu3 %v350_v36  ;;  %v297_v35 = vunpack.c.l.bf16 %v215_v29  ;;  %v298_v36 = vunpack.c.h.bf16 %v215_v29  ;;  %v205_v29 = vld [vmem:[%s1572_s28 + $0x60] sm:$0xff] }
  0x2d   : > { %556 = vmatpush.msrb.mxu0 %v287_v38  ;;  %579 = vmatpush.msrb.mxu1 %v288_v39  ;;  %v329_v38 = vunpack.c.l.bf16 %v231_v34  ;;  %v330_v39 = vunpack.c.h.bf16 %v231_v34  ;;  %v251_v34 = vld [vmem:[%s1572_s28 + $0x1d0] sm:$0xff] }
  0x2e   : > { %601 = vmatpush.msra.mxu2 %v319_v40  ;;  %624 = vmatpush.msra.mxu3 %v320_v41  ;;  %v216_v40 = vld [vmem:[%s1572_s28 + $0xb8] sm:$0xff]  ;;  %v247_v41 = vld [vmem:[%s1572_s28 + $0x1b0] sm:$0xff] }
  0x2f   : > { %557 = vmatpush.msrb.mxu0 %v257_v43  ;;  %580 = vmatpush.msrb.mxu1 %v258_v44  ;;  %v268_v43 = vunpack.c.h.bf16 %v200_v37  ;;  %v201_v44 = vld [vmem:[%s1572_s28 + $0x40] sm:$0xff]  ;;  %v299_v45 = vunpack.c.l.bf16 %v216_v40  ;;  %v361_v48 = vunpack.c.l.bf16 %v247_v41  ;;  %v362_v49 = vunpack.c.h.bf16 %v247_v41  ;;  %v252_v41 = vld [vmem:[%s1572_s28 + $0x1d8] sm:$0xff] }
  0x30   : > { %1308 = vmatmul.msk.f32.vlgmr.msrb.gmra.mxu0 %vm443_vm0, %v1595_v24  ;;  %1310 = vmatmul.msk.f32.vlgmr.msrb.gmra.mxu1 %vm443_vm0, %v1595_v24  ;;  %v370_v37 = vunpack.c.h.bf16 %v251_v34 }
  0x31   : > { %646 = vmatpush.msra.mxu0 %v351_v46  ;;  %669 = vmatpush.msra.mxu1 %v352_v47  ;;  %v300_v46 = vunpack.c.h.bf16 %v216_v40  ;;  %v232_v47 = vld [vmem:[%s1572_s28 + $0x138] sm:$0xff] }
  0x32   : > { %1305 = vmatmul.msk.f32.gmra.mxu2 %vm443_vm0, %v1583_v14  ;;  %1307 = vmatmul.msk.f32.gmra.mxu3 %vm443_vm0, %v1583_v14 }
  0x33   : > { %602 = vmatpush.msra.mxu2 %v289_v50  ;;  %625 = vmatpush.msra.mxu3 %v290_v51  ;;  %v269_v50 = vunpack.c.l.bf16 %v201_v44  ;;  %v270_v51 = vunpack.c.h.bf16 %v201_v44  ;;  %v237_v44 = vld [vmem:[%s1572_s28 + $0x160] sm:$0xff] }
  0x34   : > { %647 = vmatpush.msra.mxu0 %v321_v53  ;;  %670 = vmatpush.msra.mxu1 %v322_v54  ;;  %v331_v53 = vunpack.c.l.bf16 %v232_v47  ;;  %v332_v54 = vunpack.c.h.bf16 %v232_v47  ;;  %v206_v47 = vld [vmem:[%s1572_s28 + $0x68] sm:$0xff] }
  0x35   : > { %603 = vmatpush.msra.mxu2 %v259_v56  ;;  %626 = vmatpush.msra.mxu3 %v260_v57  ;;  %v363_v56 = vunpack.c.l.bf16 %v248_v52  ;;  %v364_v57 = vunpack.c.h.bf16 %v248_v52  ;;  %v280_v52 = vunpack.c.h.bf16 %v206_v47 }
  0x36   : > { %648 = vmatpush.msra.mxu0 %v291_v58  ;;  %671 = vmatpush.msra.mxu1 %v292_v59  ;;  %v233_v58 = vld [vmem:[%s1572_s28 + $0x140] sm:$0xff]  ;;  %v202_v59 = vld [vmem:[%s1572_s28 + $0x48] sm:$0xff] }
  0x37   : > { %692 = vmatpush.msrb.mxu2 %v353_v61  ;;  %715 = vmatpush.msrb.mxu3 %v354_v62  ;;  %v302_v61 = vunpack.c.h.bf16 %v217_v55  ;;  %v218_v62 = vld [vmem:[%s1572_s28 + $0xc8] sm:$0xff]  ;;  %v333_v63 = vunpack.c.l.bf16 %v233_v58  ;;  %v272_v2 = vunpack.c.h.bf16 %v202_v59 }
  0x38   : > { %1309 = vmatmul.msk.f32.gmra.mxu0 %vm443_vm0, %v1583_v14  ;;  %1311 = vmatmul.msk.f32.gmra.mxu1 %vm443_vm0, %v1583_v14  ;;  %v303_v3 = vunpack.c.l.bf16 %v218_v62 }
  0x39   : > { %649 = vmatpush.msra.mxu0 %v261_v0  ;;  %672 = vmatpush.msra.mxu1 %v262_v1  ;;  %v334_v0 = vunpack.c.h.bf16 %v233_v58  ;;  %v271_v1 = vunpack.c.l.bf16 %v202_v59 }
  0x3a   : > { %1312 = vmatmul.msk.f32.vlgmr.msra.gmra.mxu2 %vm443_vm0, %v1595_v24  ;;  %1314 = vmatmul.msk.f32.vlgmr.msra.gmra.mxu3 %vm443_vm0, %v1595_v24 }
  0x3b   : > { %693 = vmatpush.msrb.mxu2 %v323_v4  ;;  %716 = vmatpush.msrb.mxu3 %v324_v5  ;;  %v304_v4 = vunpack.c.h.bf16 %v218_v62  ;;  %v203_v5 = vld [vmem:[%s1572_s28 + $0x50] sm:$0xff] }
  0x3c   : > { %738 = vmatpush.msrb.mxu0 %v355_v7  ;;  %761 = vmatpush.msrb.mxu1 %v356_v8  ;;  %v273_v7 = vunpack.c.l.bf16 %v203_v5  ;;  %v274_v8 = vunpack.c.h.bf16 %v203_v5 }
  0x3d   : > { %694 = vmatpush.msrb.mxu2 %v293_v10  ;;  %717 = vmatpush.msrb.mxu3 %v294_v11  ;;  %v365_v10 = vunpack.c.l.bf16 %v249_v6  ;;  %v366_v11 = vunpack.c.h.bf16 %v249_v6 }
  0x3e   : > { %739 = vmatpush.msrb.mxu0 %v325_v12  ;;  %762 = vmatpush.msrb.mxu1 %v326_v13  ;;  %v219_v12 = vld [vmem:[%s1572_s28 + $0xd0] sm:$0xff]  ;;  %v335_v13 = vunpack.c.l.bf16 %v234_v9 }
  0x3f   : > { %695 = vmatpush.msrb.mxu2 %v263_v16  ;;  %718 = vmatpush.msrb.mxu3 %v264_v17  ;;  %v250_v16 = vld [vmem:[%s1572_s28 + $0x1c8] sm:$0xff]  ;;  %v305_v17 = vunpack.c.l.bf16 %v219_v12  ;;  %v306_v18 = vunpack.c.h.bf16 %v219_v12 }
  0x40   : > { %1316 = vmatmul.msk.f32.vlgmr.msra.gmra.mxu0 %vm443_vm0, %v1595_v24  ;;  %1318 = vmatmul.msk.f32.vlgmr.msra.gmra.mxu1 %vm443_vm0, %v1595_v24  ;;  %v368_v21 = vunpack.c.h.bf16 %v250_v16 }
  0x41   : > { %740 = vmatpush.msrb.mxu0 %v295_v19  ;;  %763 = vmatpush.msrb.mxu1 %v296_v20  ;;  %v235_v19 = vld [vmem:[%s1572_s28 + $0x150] sm:$0xff]  ;;  %v367_v20 = vunpack.c.l.bf16 %v250_v16 }
  0x42   : > { %1313 = vmatmul.msk.f32.gmra.mxu2 %vm443_vm0, %v1583_v14  ;;  %1315 = vmatmul.msk.f32.gmra.mxu3 %vm443_vm0, %v1583_v14  ;;  %v338_v26 = vunpack.c.h.bf16 %v235_v19 }
  0x43   : > { %784 = vmatpush.msra.mxu2 %v357_v23  ;;  %807 = vmatpush.msra.mxu3 %v358_v25  ;;  %v220_v23 = vld [vmem:[%s1572_s28 + $0xd8] sm:$0xff]  ;;  %v337_v25 = vunpack.c.l.bf16 %v235_v19 }
  0x44   : > { %741 = vmatpush.msrb.mxu0 %v265_v27  ;;  %764 = vmatpush.msrb.mxu1 %v266_v28  ;;  %v275_v27 = vunpack.c.l.bf16 %v204_v22  ;;  %v276_v28 = vunpack.c.h.bf16 %v204_v22 }
  0x45   : > { %785 = vmatpush.msra.mxu2 %v327_v30  ;;  %808 = vmatpush.msra.mxu3 %v328_v31  ;;  %v307_v30 = vunpack.c.l.bf16 %v220_v23  ;;  %v308_v31 = vunpack.c.h.bf16 %v220_v23 }
  0x46   : > { %830 = vmatpush.msra.mxu0 %v359_v32  ;;  %853 = vmatpush.msra.mxu1 %v360_v33  ;;  %v277_v32 = vunpack.c.l.bf16 %v205_v29  ;;  %v278_v33 = vunpack.c.h.bf16 %v205_v29 }
  0x47   : > { %786 = vmatpush.msra.mxu2 %v297_v35  ;;  %809 = vmatpush.msra.mxu3 %v298_v36  ;;  %v236_v35 = vld [vmem:[%s1572_s28 + $0x158] sm:$0xff]  ;;  %v369_v36 = vunpack.c.l.bf16 %v251_v34 }
  0x48   : > { %1317 = vmatmul.msk.f32.gmra.mxu0 %vm443_vm0, %v1583_v14  ;;  %1319 = vmatmul.msk.f32.gmra.mxu1 %vm443_vm0, %v1583_v14  ;;  %v340_v40 = vunpack.c.h.bf16 %v236_v35 }
  0x49   : > { %831 = vmatpush.msra.mxu0 %v329_v38  ;;  %854 = vmatpush.msra.mxu1 %v330_v39  ;;  %v221_v38 = vld [vmem:[%s1572_s28 + $0xe0] sm:$0xff]  ;;  %v339_v39 = vunpack.c.l.bf16 %v236_v35 }
  0x4a   : > { %1320 = vmatmul.msk.f32.vlgmr.msrb.gmra.mxu2 %vm443_vm0, %v1595_v24  ;;  %1322 = vmatmul.msk.f32.vlgmr.msrb.gmra.mxu3 %vm443_vm0, %v1595_v24 }
  0x4b   : > { %787 = vmatpush.msra.mxu2 %v267_v42  ;;  %810 = vmatpush.msra.mxu3 %v268_v43  ;;  %v309_v42 = vunpack.c.l.bf16 %v221_v38  ;;  %v310_v43 = vunpack.c.h.bf16 %v221_v38 }
  0x4c   : > { %832 = vmatpush.msra.mxu0 %v299_v45  ;;  %855 = vmatpush.msra.mxu1 %v300_v46  ;;  %v371_v45 = vunpack.c.l.bf16 %v252_v41  ;;  %v372_v46 = vunpack.c.h.bf16 %v252_v41 }
  0x4d   : > { %876 = vmatpush.msrb.mxu2 %v361_v48  ;;  %899 = vmatpush.msrb.mxu3 %v362_v49  ;;  %v222_v48 = vld [vmem:[%s1572_s28 + $0xe8] sm:$0xff]  ;;  %v341_v49 = vunpack.c.l.bf16 %v237_v44 }
  0x4e   : > { %833 = vmatpush.msra.mxu0 %v269_v50  ;;  %856 = vmatpush.msra.mxu1 %v270_v51  ;;  %v342_v50 = vunpack.c.h.bf16 %v237_v44  ;;  %v279_v51 = vunpack.c.l.bf16 %v206_v47  ;;  %v312_v55 = vunpack.c.h.bf16 %v222_v48 }
  0x4f   : > { %877 = vmatpush.msrb.mxu2 %v331_v53  ;;  %900 = vmatpush.msrb.mxu3 %v332_v54  ;;  %v207_v53 = vld [vmem:[%s1572_s28 + $0x70] sm:$0xff]  ;;  %v311_v54 = vunpack.c.l.bf16 %v222_v48 }
  0x50   : > { %1324 = vmatmul.msk.f32.vlgmr.msrb.gmra.mxu0 %vm443_vm0, %v1595_v24  ;;  %1326 = vmatmul.msk.f32.vlgmr.msrb.gmra.mxu1 %vm443_vm0, %v1595_v24 }
  0x51   : > { %922 = vmatpush.msrb.mxu0 %v363_v56  ;;  %945 = vmatpush.msrb.mxu1 %v364_v57  ;;  %v281_v56 = vunpack.c.l.bf16 %v207_v53  ;;  %v282_v57 = vunpack.c.h.bf16 %v207_v53 }
  0x52   : > { %1321 = vmatmul.msk.f32.gmra.mxu2 %vm443_vm0, %v1583_v14  ;;  %1323 = vmatmul.msk.f32.gmra.mxu3 %vm443_vm0, %v1583_v14 }
  0x53   : > { %878 = vmatpush.msrb.mxu2 %v301_v60  ;;  %901 = vmatpush.msrb.mxu3 %v302_v61 }
  0x54   : > { %923 = vmatpush.msrb.mxu0 %v333_v63  ;;  %946 = vmatpush.msrb.mxu1 %v334_v0 }
  0x55   : > { %879 = vmatpush.msrb.mxu2 %v271_v1  ;;  %902 = vmatpush.msrb.mxu3 %v272_v2 }
  0x56   : > { %924 = vmatpush.msrb.mxu0 %v303_v3  ;;  %947 = vmatpush.msrb.mxu1 %v304_v4 }
  0x58   : > { %1325 = vmatmul.msk.f32.gmra.mxu0 %vm443_vm0, %v1583_v14  ;;  %1327 = vmatmul.msk.f32.gmra.mxu1 %vm443_vm0, %v1583_v14 }
  0x59   : > { %925 = vmatpush.msrb.mxu0 %v273_v7  ;;  %948 = vmatpush.msrb.mxu1 %v274_v8 }
  0x5a   : > { %1328 = vmatmul.msk.f32.vlgmr.msra.gmra.mxu2 %vm443_vm0, %v1595_v24  ;;  %1330 = vmatmul.msk.f32.vlgmr.msra.gmra.mxu3 %vm443_vm0, %v1595_v24 }
  0x5b   : > { %968 = vmatpush.msra.mxu2 %v365_v10  ;;  %991 = vmatpush.msra.mxu3 %v366_v11 }
  0x5d   : > { %969 = vmatpush.msra.mxu2 %v335_v13  ;;  %992 = vmatpush.msra.mxu3 %v336_v15 }
  0x5f   : > { %970 = vmatpush.msra.mxu2 %v305_v17  ;;  %993 = vmatpush.msra.mxu3 %v306_v18 }
  0x60   : > { %1332 = vmatmul.msk.f32.vlgmr.msra.gmra.mxu0 %vm443_vm0, %v1595_v24  ;;  %1334 = vmatmul.msk.f32.vlgmr.msra.gmra.mxu1 %vm443_vm0, %v1595_v24 }
  0x61   : > { %1014 = vmatpush.msra.mxu0 %v367_v20  ;;  %1037 = vmatpush.msra.mxu1 %v368_v21 }
  0x62   : > { %1329 = vmatmul.msk.f32.gmra.mxu2 %vm443_vm0, %v1583_v14  ;;  %1331 = vmatmul.msk.f32.gmra.mxu3 %vm443_vm0, %v1583_v14 }
  0x63   : > { %1015 = vmatpush.msra.mxu0 %v337_v25  ;;  %1038 = vmatpush.msra.mxu1 %v338_v26  ;;  %v1798_v25 = vld [vmem:[%s1773_s11 + $0x8] sm:$0xff] }
  0x64   : > { %971 = vmatpush.msra.mxu2 %v275_v27  ;;  %994 = vmatpush.msra.mxu3 %v276_v28  ;;  %v391_v28 = vperm.slane %v1798_v25, 0  ;;  %v392_v29 = vperm.slane %v1798_v25, 1  ;;  %v394_v47 = vperm.slane %v1798_v25, 3  ;;  %v395_v48 = vperm.slane %v1798_v25, 4 }
  0x65   : > { %1016 = vmatpush.msra.mxu0 %v307_v30  ;;  %1039 = vmatpush.msra.mxu1 %v308_v31 }
  0x67   : > { %1017 = vmatpush.msra.mxu0 %v277_v32  ;;  %1040 = vmatpush.msra.mxu1 %v278_v33 }
  0x68   : > { %1333 = vmatmul.msk.f32.gmra.mxu0 %vm443_vm0, %v1583_v14  ;;  %1335 = vmatmul.msk.f32.gmra.mxu1 %vm443_vm0, %v1583_v14 }
  0x6a   : > { %1336 = vmatmul.msk.f32.vlgmr.msrb.gmra.mxu2 %vm443_vm0, %v1595_v24  ;;  %1338 = vmatmul.msk.f32.vlgmr.msrb.gmra.mxu3 %vm443_vm0, %v1595_v24 }
  0x6b   : > { %1060 = vmatpush.msrb.mxu2 %v369_v36  ;;  %1083 = vmatpush.msrb.mxu3 %v370_v37 }
  0x6d   : > { %1061 = vmatpush.msrb.mxu2 %v339_v39  ;;  %1084 = vmatpush.msrb.mxu3 %v340_v40 }
  0x6f   : > { %1062 = vmatpush.msrb.mxu2 %v309_v42  ;;  %1085 = vmatpush.msrb.mxu3 %v310_v43 }
  0x70   : > { %1340 = vmatmul.msk.f32.vlgmr.msrb.gmra.mxu0 %vm443_vm0, %v1595_v24  ;;  %1342 = vmatmul.msk.f32.vlgmr.msrb.gmra.mxu1 %vm443_vm0, %v1595_v24 }
  0x71   : > { %1106 = vmatpush.msrb.mxu0 %v371_v45  ;;  %1129 = vmatpush.msrb.mxu1 %v372_v46  ;;  %v393_v46 = vperm.slane %v1798_v25, 2 }
  0x72   : > { %1337 = vmatmul.msk.f32.gmra.mxu2 %vm443_vm0, %v1583_v14  ;;  %1339 = vmatmul.msk.f32.gmra.mxu3 %vm443_vm0, %v1583_v14 }
  0x73   : > { %1107 = vmatpush.msrb.mxu0 %v341_v49  ;;  %1130 = vmatpush.msrb.mxu1 %v342_v50  ;;  %v396_v49 = vperm.slane %v1798_v25, 5 }
  0x74   : > { %1063 = vmatpush.msrb.mxu2 %v279_v51  ;;  %1086 = vmatpush.msrb.mxu3 %v280_v52 }
  0x75   : > { %1108 = vmatpush.msrb.mxu0 %v311_v54  ;;  %1131 = vmatpush.msrb.mxu1 %v312_v55 }
  0x77   : > { %1109 = vmatpush.msrb.mxu0 %v281_v56  ;;  %1132 = vmatpush.msrb.mxu1 %v282_v57 }
  0x78   : > { %1341 = vmatmul.msk.f32.gmra.mxu0 %vm443_vm0, %v1583_v14  ;;  %1343 = vmatmul.msk.f32.gmra.mxu1 %vm443_vm0, %v1583_v14 }
  0x7a   : > { %1344 = vmatmul.msk.f32.vlgmr.msra.gmra.mxu2 %vm443_vm0, %v1595_v24  ;;  %1346 = vmatmul.msk.f32.vlgmr.msra.gmra.mxu3 %vm443_vm0, %v1595_v24 }
  0x80   : > { %1348 = vmatmul.msk.f32.vlgmr.msra.gmra.mxu0 %vm443_vm0, %v1595_v24  ;;  %1350 = vmatmul.msk.f32.vlgmr.msra.gmra.mxu1 %vm443_vm0, %v1595_v24 }
  0x82   : > { %1345 = vmatmul.msk.f32.gmra.mxu2 %vm443_vm0, %v1583_v14  ;;  %1347 = vmatmul.msk.f32.gmra.mxu3 %vm443_vm0, %v1583_v14 }
  0x88   : > { %1349 = vmatmul.msk.f32.gmra.mxu0 %vm443_vm0, %v1583_v14  ;;  %1351 = vmatmul.msk.f32.gmra.mxu1 %vm443_vm0, %v1583_v14 }
  0x8a   : > { %1352 = vmatmul.msk.f32.vlgmr.msrb.gmra.mxu2 %vm443_vm0, %v1595_v24  ;;  %1354 = vmatmul.msk.f32.vlgmr.msrb.gmra.mxu3 %vm443_vm0, %v1595_v24 }
  0x90   : > { %1356 = vmatmul.msk.f32.vlgmr.msrb.gmra.mxu0 %vm443_vm0, %v1595_v24  ;;  %1358 = vmatmul.msk.f32.vlgmr.msrb.gmra.mxu1 %vm443_vm0, %v1595_v24  ;;  %v1776_v24 = vld [vmem:[%s1773_s11] sm:$0xff] }
  0x91   : > { %v383_v58 = vperm.slane %v1776_v24, 0  ;;  %v384_v59 = vperm.slane %v1776_v24, 1  ;;  %v385_v3 = vperm.slane %v1776_v24, 2  ;;  %v386_v4 = vperm.slane %v1776_v24, 3 }
  0x92   : > { %1353 = vmatmul.msk.f32.gmra.mxu2 %vm443_vm0, %v1583_v14  ;;  %1355 = vmatmul.msk.f32.gmra.mxu3 %vm443_vm0, %v1583_v14  ;;  %v387_v5 = vperm.slane %v1776_v24, 4  ;;  %v388_v6 = vperm.slane %v1776_v24, 5  ;;  %v389_v26 = vperm.slane %v1776_v24, 6  ;;  %v390_v27 = vperm.slane %v1776_v24, 7 }
  0x98   : > { %1357 = vmatmul.msk.f32.gmra.mxu0 %vm443_vm0, %v1583_v14  ;;  %1359 = vmatmul.msk.f32.gmra.mxu1 %vm443_vm0, %v1583_v14 }
  0xa3   : > { %v467_v60 = vpop.f32.mrf.mxu0  ;;  %v490_v61 = vpop.f32.mrf.mxu1 }
  0xa4   : > { %v468_v62 = vadd.f32 %v467_v60, %v383_v58  ;;  %v491_v63 = vadd.f32 %v490_v61, %v384_v59 }
  0xa5   : > { %v470_v0 = vpop.f32.mrf.mxu2  ;;  %v493_v14 = vpop.f32.mrf.mxu3 }
  0xa6   : > { %1140 = vst [vmem:[%s1782_s19] sm:$0xff] %v468_v62  ;;  %v471_v1 = vadd.f32 %v470_v0, %v383_v58  ;;  %v494_v2 = vadd.f32 %v493_v14, %v384_v59  ;;  %v1825_v14 = vld [vmem:[%s1773_s11 + $0x10] sm:$0xff] }
  0xa7   : > { %1141 = vst [vmem:[%s1782_s19 + $0x8] sm:$0xff] %v491_v63 }
  0xa8   : > { %1170 = vst [vmem:[%s1782_s19 + $0xf0] sm:$0xff] %v471_v1  ;;  %v397_v1 = vperm.slane %v1798_v25, 6 }
  0xa9   : > { %1171 = vst [vmem:[%s1782_s19 + $0xf8] sm:$0xff] %v494_v2  ;;  %v398_v2 = vperm.slane %v1798_v25, 7  ;;  %v403_v25 = vperm.slane %v1825_v14, 4 }
  0xad   : > { %v513_v7 = vpop.f32.mrf.mxu2  ;;  %v536_v8 = vpop.f32.mrf.mxu3 }
  0xae   : > { %v514_v9 = vadd.f32 %v513_v7, %v385_v3  ;;  %v537_v10 = vadd.f32 %v536_v8, %v386_v4  ;;  %v559_v11 = vpop.f32.mrf.mxu0  ;;  %v582_v12 = vpop.f32.mrf.mxu1 }
  0xaf   : > { %v560_v13 = vadd.f32 %v559_v11, %v387_v5  ;;  %v583_v15 = vadd.f32 %v582_v12, %v388_v6 }
  0xb0   : > { %1142 = vst [vmem:[%s1782_s19 + $0x10] sm:$0xff] %v514_v9 }
  0xb1   : > { %1143 = vst [vmem:[%s1782_s19 + $0x18] sm:$0xff] %v537_v10 }
  0xb2   : > { %1144 = vst [vmem:[%s1782_s19 + $0x20] sm:$0xff] %v560_v13 }
  0xb3   : > { %1145 = vst [vmem:[%s1782_s19 + $0x28] sm:$0xff] %v583_v15 }
  0xb5   : > { %v516_v16 = vpop.f32.mrf.mxu2  ;;  %v539_v17 = vpop.f32.mrf.mxu3 }
  0xb6   : > { %v517_v18 = vadd.f32 %v516_v16, %v385_v3  ;;  %v540_v19 = vadd.f32 %v539_v17, %v386_v4  ;;  %v562_v20 = vpop.f32.mrf.mxu0  ;;  %v585_v21 = vpop.f32.mrf.mxu1  ;;  %v399_v3 = vperm.slane %v1825_v14, 0  ;;  %v400_v4 = vperm.slane %v1825_v14, 1 }
  0xb7   : > { %v563_v22 = vadd.f32 %v562_v20, %v387_v5  ;;  %v586_v23 = vadd.f32 %v585_v21, %v388_v6 }
  0xb8   : > { %1172 = vst [vmem:[%s1782_s19 + $0x100] sm:$0xff] %v517_v18 }
  0xb9   : > { %1173 = vst [vmem:[%s1782_s19 + $0x108] sm:$0xff] %v540_v19 }
  0xba   : > { %1174 = vst [vmem:[%s1782_s19 + $0x110] sm:$0xff] %v563_v22  ;;  %v401_v22 = vperm.slane %v1825_v14, 2 }
  0xbb   : > { %1175 = vst [vmem:[%s1782_s19 + $0x118] sm:$0xff] %v586_v23  ;;  %v402_v23 = vperm.slane %v1825_v14, 3 }
  0xbd   : > { %v605_v30 = vpop.f32.mrf.mxu2  ;;  %v628_v31 = vpop.f32.mrf.mxu3 }
  0xbe   : > { %v606_v32 = vadd.f32 %v605_v30, %v389_v26  ;;  %v629_v33 = vadd.f32 %v628_v31, %v390_v27  ;;  %v651_v34 = vpop.f32.mrf.mxu0  ;;  %v674_v35 = vpop.f32.mrf.mxu1 }
  0xbf   : > { %v652_v36 = vadd.f32 %v651_v34, %v391_v28  ;;  %v675_v37 = vadd.f32 %v674_v35, %v392_v29 }
  0xc0   : > { %1146 = vst [vmem:[%s1782_s19 + $0x30] sm:$0xff] %v606_v32 }
  0xc1   : > { %1147 = vst [vmem:[%s1782_s19 + $0x38] sm:$0xff] %v629_v33 }
  0xc2   : > { %1148 = vst [vmem:[%s1782_s19 + $0x40] sm:$0xff] %v652_v36 }
  0xc3   : > { %1149 = vst [vmem:[%s1782_s19 + $0x48] sm:$0xff] %v675_v37 }
  0xc5   : > { %v608_v38 = vpop.f32.mrf.mxu2  ;;  %v631_v39 = vpop.f32.mrf.mxu3 }
  0xc6   : > { %v609_v40 = vadd.f32 %v608_v38, %v389_v26  ;;  %v632_v41 = vadd.f32 %v631_v39, %v390_v27  ;;  %v654_v42 = vpop.f32.mrf.mxu0  ;;  %v677_v43 = vpop.f32.mrf.mxu1  ;;  %v404_v26 = vperm.slane %v1825_v14, 5 }
  0xc7   : > { %v655_v44 = vadd.f32 %v654_v42, %v391_v28  ;;  %v678_v45 = vadd.f32 %v677_v43, %v392_v29  ;;  %v378_v43 = vld [vmem:[%s1773_s11 + $0x18] sm:$0x3f] }
  0xc8   : > { %1176 = vst [vmem:[%s1782_s19 + $0x120] sm:$0xff] %v609_v40 }
  0xc9   : > { %1177 = vst [vmem:[%s1782_s19 + $0x128] sm:$0xff] %v632_v41 }
  0xca   : > { %1178 = vst [vmem:[%s1782_s19 + $0x130] sm:$0xff] %v655_v44  ;;  %v405_v44 = vperm.slane %v1825_v14, 6 }
  0xcb   : > { %1179 = vst [vmem:[%s1782_s19 + $0x138] sm:$0xff] %v678_v45  ;;  %v406_v45 = vperm.slane %v1825_v14, 7  ;;  %v411_v14 = vperm.slane %v378_v43, 4 }
  0xcd   : > { %v697_v50 = vpop.f32.mrf.mxu2  ;;  %v720_v51 = vpop.f32.mrf.mxu3 }
  0xce   : > { %v698_v52 = vadd.f32 %v697_v50, %v393_v46  ;;  %v721_v53 = vadd.f32 %v720_v51, %v394_v47  ;;  %v743_v54 = vpop.f32.mrf.mxu0  ;;  %v766_v55 = vpop.f32.mrf.mxu1 }
  0xcf   : > { %v744_v56 = vadd.f32 %v743_v54, %v395_v48  ;;  %v767_v57 = vadd.f32 %v766_v55, %v396_v49 }
  0xd0   : > { %1150 = vst [vmem:[%s1782_s19 + $0x50] sm:$0xff] %v698_v52 }
  0xd1   : > { %1151 = vst [vmem:[%s1782_s19 + $0x58] sm:$0xff] %v721_v53 }
  0xd2   : > { %1152 = vst [vmem:[%s1782_s19 + $0x60] sm:$0xff] %v744_v56 }
  0xd3   : > { %1153 = vst [vmem:[%s1782_s19 + $0x68] sm:$0xff] %v767_v57 }
  0xd5   : > { %v700_v24 = vpop.f32.mrf.mxu2  ;;  %v723_v58 = vpop.f32.mrf.mxu3 }
  0xd6   : > { %v701_v59 = vadd.f32 %v700_v24, %v393_v46  ;;  %v724_v60 = vadd.f32 %v723_v58, %v394_v47  ;;  %v746_v61 = vpop.f32.mrf.mxu0  ;;  %v769_v62 = vpop.f32.mrf.mxu1  ;;  %v407_v46 = vperm.slane %v378_v43, 0  ;;  %v408_v47 = vperm.slane %v378_v43, 1 }
  0xd7   : > { %v747_v63 = vadd.f32 %v746_v61, %v395_v48  ;;  %v770_v0 = vadd.f32 %v769_v62, %v396_v49 }
  0xd8   : > { %1180 = vst [vmem:[%s1782_s19 + $0x140] sm:$0xff] %v701_v59 }
  0xd9   : > { %1181 = vst [vmem:[%s1782_s19 + $0x148] sm:$0xff] %v724_v60 }
  0xda   : > { %1182 = vst [vmem:[%s1782_s19 + $0x150] sm:$0xff] %v747_v63  ;;  %v409_v63 = vperm.slane %v378_v43, 2 }
  0xdb   : > { %1183 = vst [vmem:[%s1782_s19 + $0x158] sm:$0xff] %v770_v0  ;;  %v410_v0 = vperm.slane %v378_v43, 3 }
  0xdd   : > { %v789_v5 = vpop.f32.mrf.mxu2  ;;  %v812_v6 = vpop.f32.mrf.mxu3 }
  0xde   : > { %v790_v7 = vadd.f32 %v789_v5, %v397_v1  ;;  %v813_v8 = vadd.f32 %v812_v6, %v398_v2  ;;  %v835_v9 = vpop.f32.mrf.mxu0  ;;  %v858_v10 = vpop.f32.mrf.mxu1 }
  0xdf   : > { %v836_v11 = vadd.f32 %v835_v9, %v399_v3  ;;  %v859_v12 = vadd.f32 %v858_v10, %v400_v4 }
  0xe0   : > { %1154 = vst [vmem:[%s1782_s19 + $0x70] sm:$0xff] %v790_v7 }
  0xe1   : > { %1155 = vst [vmem:[%s1782_s19 + $0x78] sm:$0xff] %v813_v8 }
  0xe2   : > { %1156 = vst [vmem:[%s1782_s19 + $0x80] sm:$0xff] %v836_v11 }
  0xe3   : > { %1157 = vst [vmem:[%s1782_s19 + $0x88] sm:$0xff] %v859_v12 }
  0xe5   : > { %v792_v13 = vpop.f32.mrf.mxu2  ;;  %v815_v15 = vpop.f32.mrf.mxu3 }
  0xe6   : > { %v793_v16 = vadd.f32 %v792_v13, %v397_v1  ;;  %v816_v17 = vadd.f32 %v815_v15, %v398_v2  ;;  %v838_v18 = vpop.f32.mrf.mxu0  ;;  %v861_v19 = vpop.f32.mrf.mxu1  ;;  %v412_v1 = vperm.slane %v378_v43, 5 }
  0xe7   : > { %v839_v20 = vadd.f32 %v838_v18, %v399_v3  ;;  %v862_v21 = vadd.f32 %v861_v19, %v400_v4 }
  0xe8   : > { %1184 = vst [vmem:[%s1782_s19 + $0x160] sm:$0xff] %v793_v16 }
  0xe9   : > { %1185 = vst [vmem:[%s1782_s19 + $0x168] sm:$0xff] %v816_v17 }
  0xea   : > { %1186 = vst [vmem:[%s1782_s19 + $0x170] sm:$0xff] %v839_v20 }
  0xeb   : > { %1187 = vst [vmem:[%s1782_s19 + $0x178] sm:$0xff] %v862_v21 }
  0xed   : > { %v881_v27 = vpop.f32.mrf.mxu2  ;;  %v904_v28 = vpop.f32.mrf.mxu3 }
  0xee   : > { %v882_v29 = vadd.f32 %v881_v27, %v401_v22  ;;  %v905_v30 = vadd.f32 %v904_v28, %v402_v23  ;;  %v927_v31 = vpop.f32.mrf.mxu0  ;;  %v950_v32 = vpop.f32.mrf.mxu1 }
  0xef   : > { %v928_v33 = vadd.f32 %v927_v31, %v403_v25  ;;  %v951_v34 = vadd.f32 %v950_v32, %v404_v26 }
  0xf0   : > { %1158 = vst [vmem:[%s1782_s19 + $0x90] sm:$0xff] %v882_v29 }
  0xf1   : > { %1159 = vst [vmem:[%s1782_s19 + $0x98] sm:$0xff] %v905_v30 }
  0xf2   : > { %1160 = vst [vmem:[%s1782_s19 + $0xa0] sm:$0xff] %v928_v33 }
  0xf3   : > { %1161 = vst [vmem:[%s1782_s19 + $0xa8] sm:$0xff] %v951_v34 }
  0xf5   : > { %v884_v35 = vpop.f32.mrf.mxu2  ;;  %v907_v36 = vpop.f32.mrf.mxu3 }
  0xf6   : > { %v885_v37 = vadd.f32 %v884_v35, %v401_v22  ;;  %v908_v38 = vadd.f32 %v907_v36, %v402_v23  ;;  %v930_v39 = vpop.f32.mrf.mxu0  ;;  %v953_v40 = vpop.f32.mrf.mxu1 }
  0xf7   : > { %v931_v41 = vadd.f32 %v930_v39, %v403_v25  ;;  %v954_v42 = vadd.f32 %v953_v40, %v404_v26 }
  0xf8   : > { %1188 = vst [vmem:[%s1782_s19 + $0x180] sm:$0xff] %v885_v37 }
  0xf9   : > { %1189 = vst [vmem:[%s1782_s19 + $0x188] sm:$0xff] %v908_v38 }
  0xfa   : > { %1190 = vst [vmem:[%s1782_s19 + $0x190] sm:$0xff] %v931_v41 }
  0xfb   : > { %1191 = vst [vmem:[%s1782_s19 + $0x198] sm:$0xff] %v954_v42 }
  0xfd   : > { %v973_v48 = vpop.f32.mrf.mxu2  ;;  %v996_v49 = vpop.f32.mrf.mxu3 }
  0xfe   : > { %v974_v50 = vadd.f32 %v973_v48, %v405_v44  ;;  %v997_v51 = vadd.f32 %v996_v49, %v406_v45  ;;  %v1019_v52 = vpop.f32.mrf.mxu0  ;;  %v1042_v53 = vpop.f32.mrf.mxu1 }
  0xff   : > { %v1020_v54 = vadd.f32 %v1019_v52, %v407_v46  ;;  %v1043_v55 = vadd.f32 %v1042_v53, %v408_v47 }
 0x100   : > { %1162 = vst [vmem:[%s1782_s19 + $0xb0] sm:$0xff] %v974_v50 }
 0x101   : > { %1163 = vst [vmem:[%s1782_s19 + $0xb8] sm:$0xff] %v997_v51 }
 0x102   : > { %1164 = vst [vmem:[%s1782_s19 + $0xc0] sm:$0xff] %v1020_v54 }
 0x103   : > { %1165 = vst [vmem:[%s1782_s19 + $0xc8] sm:$0xff] %v1043_v55 }
 0x105   : > { %v976_v56 = vpop.f32.mrf.mxu2  ;;  %v999_v57 = vpop.f32.mrf.mxu3 }
 0x106   : > { %v977_v24 = vadd.f32 %v976_v56, %v405_v44  ;;  %v1000_v58 = vadd.f32 %v999_v57, %v406_v45  ;;  %v1022_v59 = vpop.f32.mrf.mxu0  ;;  %v1045_v60 = vpop.f32.mrf.mxu1 }
 0x107   : > { %v1023_v61 = vadd.f32 %v1022_v59, %v407_v46  ;;  %v1046_v62 = vadd.f32 %v1045_v60, %v408_v47 }
 0x108   : > { %1192 = vst [vmem:[%s1782_s19 + $0x1a0] sm:$0xff] %v977_v24 }
 0x109   : > { %1193 = vst [vmem:[%s1782_s19 + $0x1a8] sm:$0xff] %v1000_v58 }
 0x10a   : > { %1194 = vst [vmem:[%s1782_s19 + $0x1b0] sm:$0xff] %v1023_v61 }
 0x10b   : > { %1195 = vst [vmem:[%s1782_s19 + $0x1b8] sm:$0xff] %v1046_v62 }
 0x10d   : > { %v1065_v2 = vpop.f32.mrf.mxu2  ;;  %v1088_v3 = vpop.f32.mrf.mxu3 }
 0x10e   : > { %v1066_v4 = vadd.f32 %v1065_v2, %v409_v63  ;;  %v1089_v5 = vadd.f32 %v1088_v3, %v410_v0  ;;  %v1111_v6 = vpop.f32.mrf.mxu0  ;;  %v1134_v7 = vpop.f32.mrf.mxu1 }
 0x10f   : > { %v1112_v8 = vadd.f32 %v1111_v6, %v411_v14  ;;  %v1135_v9 = vadd.f32 %v1134_v7, %v412_v1 }
 0x110   : > { %1166 = vst [vmem:[%s1782_s19 + $0xd0] sm:$0xff] %v1066_v4 }
 0x111   : > { %1167 = vst [vmem:[%s1782_s19 + $0xd8] sm:$0xff] %v1089_v5 }
 0x112   : > { %1168 = vst [vmem:[%s1782_s19 + $0xe0] sm:$0xff] %v1112_v8 }
 0x113   : > { %1169 = vst [vmem:[%s1782_s19 + $0xe8] sm:$0xff] %v1135_v9 }
 0x115   : > { %v1068_v10 = vpop.f32.mrf.mxu2  ;;  %v1091_v11 = vpop.f32.mrf.mxu3 }
 0x116   : > { %v1069_v12 = vadd.f32 %v1068_v10, %v409_v63  ;;  %v1092_v13 = vadd.f32 %v1091_v11, %v410_v0  ;;  %v1114_v15 = vpop.f32.mrf.mxu0  ;;  %v1137_v16 = vpop.f32.mrf.mxu1 }
 0x117   : > { %v1115_v17 = vadd.f32 %v1114_v15, %v411_v14  ;;  %v1138_v18 = vadd.f32 %v1137_v16, %v412_v1  ;;  %1207 = sbr.rel (!%p1557_p5) target bundleno = 316 (0x13c), region = 36 }
 0x118   : > { %1196 = vst [vmem:[%s1782_s19 + $0x1c0] sm:$0xff] %v1069_v12 }
 0x119   : > { %1197 = vst [vmem:[%s1782_s19 + $0x1c8] sm:$0xff] %v1092_v13 }
 0x11a   : > { %1198 = vst [vmem:[%s1782_s19 + $0x1d0] sm:$0xff] %v1115_v17 }
 0x11b   : > { %1199 = vst [vmem:[%s1782_s19 + $0x1d8] sm:$0xff] %v1138_v18 }
 0x11c   : > { %s1951_s24 = smov (!%p1210_p12, %s1209_s24), 30 }
 0x11d   : > { %s1360_s25 = sshll.u32 %s1951_s24, 4 }
 0x11e   : > { %s1213_s26 = ssub.s32 480, %s1360_s25 }
 0x11f   : > { %s1214_s27 = sshll.u32 %s1213_s26, 4 }
 0x120   : > { %1215 = vsyncadd %s1875_s20, %s1214_s27  ;;  %p1884_p13 = scmp.ne.s32.totalorder %s1360_s25, 0  ;;  %s1368_s22 = smul.u32 240, %s1540_s16 }
 0x121   : > { %s1363_s29 = sshll.u32 %s1951_s24, 3  ;;  %s1221_s30 = sshll.u32 %s1782_s19, 4  ;;  %s1894_s30 = int_to_ptr.vmem [resolvable:$true] %s1221_s30 }
 0x122   : > { %s1218_s6 = scalar_lea.hbm %s1942_s3, %s1368_s22  ;;  %s1370_s8 = sshll.u32 %s1951_s24, 8 }
 0x123   : > { %s1223_s7 = sshll.u32 %s1218_s6, 4  ;;  %s1421_s9 = sshra.s32 %s1894_s30, 4  ;;  %s1897_s7 = int_to_ptr.hbm [resolvable:$true] %s1223_s7  ;;  %s1422_s9 = int_to_ptr.vmem [resolvable:$true] %s1421_s9 }
 0x124   : > { %s1423_s10 = sshrl.u32 %s1370_s8, 4  ;;  %s1496_s16 = smov [#allocation2]  }
 0x125   : > { %s1428_s11 = scalar_lea.vmem %s1422_s9, %s1423_s10  ;;  %s1432_s17 = scalar_lea.vmem %s1496_s16, 960 }
 0x126   : > { %p1429_p0 = scmp.ne.s32.totalorder %s1422_s9, %s1428_s11  ;;  %p1434_p3 = scmp.lt.s32.totalorder %s1432_s17, %s1428_s11 }
 0x128   : > { %p1430_p1 = pnand %p1429_p0, %p1884_p13 }
 0x12a   : > { %p1431_p2 = pneg %p1430_p1 }
 0x12c   : > { %p1436_p4 = pnand %p1434_p3, %p1431_p2 }
 0x12e   : > { %1439 = shalt.err (!%p1436_p4)
}
 0x12f   : > { %s1440_s19 = sshra.s32 %s1897_s7, 4  ;;  %s1451_s22 = scalar_lea.hbm %s1942_s3, 3824  ;;  %s1441_s19 = int_to_ptr.hbm [resolvable:$true] %s1440_s19 }
 0x130   : > { %s1447_s25 = scalar_lea.hbm %s1441_s19, %s1423_s10  ;;  %p1452_p9 = scmp.lt.s32.totalorder %s1441_s19, %s1942_s3 }
 0x131   : > { %p1448_p5 = scmp.ne.s32.totalorder %s1441_s19, %s1447_s25  ;;  %p1453_p10 = scmp.lt.s32.totalorder %s1451_s22, %s1447_s25 }
 0x133   : > { %p1449_p7 = pnand %p1448_p5, %p1884_p13  ;;  %p1454_p11 = por %p1453_p10, %p1452_p9 }
 0x135   : > { %p1450_p8 = pneg %p1449_p7 }
 0x137   : > { %p1455_p12 = pnand %p1454_p11, %p1450_p8 }
 0x139   : > { %1458 = shalt.err (!%p1455_p12)
}
 0x13a   : > { %s1497_s6 = smov 3840   ;;  %s1498_s9 = smov 30592  }
 0x13b   : > { %1229 = dma.vmem_to_hbm [thread:$0]  (%p1884_p13), %s1894_s30, %s1370_s8, %s1897_s7, %s1875_s20, %s1497_s6, %s1498_s9, %s1363_s29  }
 0x13c PF: > { %p1386_p0 = scmp.ge.s32.totalorder %s1494_s15, 2  ;;  %s1238_s10 = sand.u32 1, %s1482_s12  }
 0x13d   : > { %s1239_s11 = scalar_lea.sflag [#allocation3], %s1238_s10 }
 0x13e   : > { %p1383_p1 = pnand %p1386_p0, %p1561_p6 }
 0x140   : > { %p1384_p2 = pneg %p1383_p1 }
 0x142   : > { %1477 = dma.done.wait (%p1384_p2), %s1239_s11, 7680  }
 0x143   : > { %1479 = vsyncadd (%p1384_p2), %s1239_s11, 4294959616  ;;  %p13_p3 = scmp.ge.s32.totalorder %s1544_s18, 10   ;;  %s1946_s12 = smov %s1486_s13 }
 0x144   : > { %s1947_s13 = smov %s1490_s14  ;;  %s1948_s14 = smov %s1555_s21 }
 0x145   : > { %s1949_s15 = smov %s1544_s18  ;;  %15 = sbr.rel (!%p13_p3) target bundleno = 3 (0x3), region = 70 }
 0x14a   :  { %1245 = vsyncpa [#allocation3], 1 }
 0x14b   :  { %1247 = vsyncpa [#allocation3 + $0x1], 1 }

</bundles_post_ra>
